<compile_context>
chip_gen: v5e
topology: v5e:2x2
jax: 0.10.0
libtpu: 0.0.40
codegen_flags: <defaults>
</compile_context>

<pallas_src>
import numpy as np
import jax
import jax.numpy as jnp
from jax.experimental import pallas as pl
from jax.experimental.pallas import tpu as pltpu

EPS = 1e-5  # nn.BatchNorm2d default eps


# ---------------------------------------------------------------------------
# Pallas kernel
# ---------------------------------------------------------------------------
def _make_kernel(Wp, Cin, C1, C2, R1, R2, cnt1, cnt2):
    def _conv9(src_ref, w_ref, R, Cout):
        # 9 shifted-row-view matmuls accumulated in f32 (exact conv FLOPs, no im2col copy).
        acc = jnp.zeros((R, Cout), jnp.float32)
        for ky in range(3):
            for kx in range(3):
                off = ky * Wp + kx
                acc = acc + jnp.dot(src_ref[pl.ds(off, R), :], w_ref[ky * 3 + kx],
                                    preferred_element_type=jnp.float32)
        return acc

    def _bn_relu(acc, p_ref, mask, cnt):
        # p_ref rows: 0 = conv bias, 1 = bn gamma, 2 = bn beta   (all (1, C), lane broadcast)
        acc = acc + p_ref[0:1, :]
        inv = 1.0 / cnt
        s = jnp.sum(acc * mask, axis=0, keepdims=True)                # masked batch sum
        ss = jnp.sum((acc * acc) * mask, axis=0, keepdims=True)       # masked sum of squares
        mean = s * inv
        var = jnp.maximum(ss * inv - mean * mean, 0.0)                # clamp (E[x^2]-m^2)
        scale = p_ref[1:2, :] * jax.lax.rsqrt(var + EPS)
        shift = p_ref[2:3, :] - scale * mean
        return jnp.maximum(acc * scale + shift, 0.0)                  # fused normalize+ReLU

    def kernel(x_ref, w1_ref, w2_ref, p1_ref, p2_ref, m1_ref, m2_ref,
               o_ref, h0_ref, h1_ref):
        # ---- MaxPool2d(2): max over 4 lane-adjacent slices (bf16, pure VPU) -------------
        xv = x_ref[...]                                               # (R0, 4*Cin) bf16
        h0 = jnp.maximum(jnp.maximum(xv[:, 0:Cin], xv[:, Cin:2 * Cin]),
                         jnp.maximum(xv[:, 2 * Cin:3 * Cin], xv[:, 3 * Cin:4 * Cin]))
        h0_ref[...] = h0                                              # conv1 input slab

        # ---- conv1 + BN1 + ReLU ----------------------------------------------------------
        acc1 = _conv9(h0_ref, w1_ref, R1, C1)
        y1 = _bn_relu(acc1, p1_ref, m1_ref[...], cnt1)
        h1_ref[...] = y1.astype(jnp.bfloat16)                         # conv2 input slab

        # ---- conv2 + BN2 + ReLU ----------------------------------------------------------
        acc2 = _conv9(h1_ref, w2_ref, R2, C2)
        y2 = _bn_relu(acc2, p2_ref, m2_ref[...], cnt2)
        o_ref[...] = y2

    return kernel


# ---------------------------------------------------------------------------
# wrapper
# ---------------------------------------------------------------------------
def down_scale(x_nchw, w1, b1, g1, be1, w2, b2, g2, be2):
    x = jnp.asarray(x_nchw)
    N, Cin, H, W = x.shape
    C1, C2 = int(w1.shape[0]), int(w2.shape[0])
    Hp, Wp = H // 2, W // 2
    OH1, OW1 = Hp - 2, Wp - 2
    OH2, OW2 = OH1 - 2, OW1 - 2
    R0 = N * Hp * Wp                      # pooled positions (conv1 input rows)
    R1 = R0 - (2 * Wp + 2)                # conv1 output rows (incl. garbage rows)
    R2 = R0 - 2 * (2 * Wp + 2)            # conv2 output rows (incl. garbage rows)

    # NCHW f32 -> (N*Hp*Wp, 4*Cin) bf16 with each 2x2 pool window lane-adjacent (XLA glue).
    xb = jnp.transpose(x.astype(jnp.bfloat16), (0, 2, 3, 1))                  # NHWC
    xb = xb.reshape(N, Hp, 2, Wp, 2, Cin).transpose(0, 1, 3, 2, 4, 5)
    x2d = xb.reshape(R0, 4 * Cin)

    # conv weights: torch (Cout, Cin, 3, 3) -> (9, Cin, Cout) bf16 (tap-major, dense)
    w1p = jnp.asarray(np.transpose(np.asarray(w1, np.float32), (2, 3, 1, 0))
                      .reshape(9, Cin, C1), jnp.bfloat16)
    w2p = jnp.asarray(np.transpose(np.asarray(w2, np.float32), (2, 3, 1, 0))
                      .reshape(9, C1, C2), jnp.bfloat16)
    # packed per-channel params: rows = (conv bias, bn gamma, bn beta)
    p1 = jnp.asarray(np.stack([np.asarray(b1, np.float32), np.asarray(g1, np.float32),
                               np.asarray(be1, np.float32)]))                  # (3, C1)
    p2 = jnp.asarray(np.stack([np.asarray(b2, np.float32), np.asarray(g2, np.float32),
                               np.asarray(be2, np.float32)]))                  # (3, C2)

    # BN validity masks: exclude rows whose 3x3 window crosses a width/height/batch boundary
    def _mask(R, OH, OW):
        r = np.arange(R)
        ok = (((r // Wp) % Hp) < OH) & ((r % Wp) < OW)
        return ok.astype(np.float32)[:, None]
    m1 = jnp.asarray(_mask(R1, OH1, OW1))
    m2 = jnp.asarray(_mask(R2, OH2, OW2))

    kernel = _make_kernel(Wp, Cin, C1, C2, R1, R2,
                          float(N * OH1 * OW1), float(N * OH2 * OW2))

    # scoped-VMEM budget from the actual buffers (with generous headroom)
    raw_bytes = (x2d.size * 2 + w1p.size * 2 + w2p.size * 2
                 + (p1.size + p2.size + m1.size + m2.size) * 4
                 + R0 * Cin * 2 + R1 * C1 * 2 + R2 * C2 * 4)
    vmem_limit = int(min(64 << 20, max(32 << 20, 4 * raw_bytes + (4 << 20))))

    vmem = pl.BlockSpec(memory_space=pltpu.MemorySpace.VMEM)
    # TODO(synk): for large N*H*W (esp. v7x's 64 MiB VMEM) add a row/batch-tiled grid with a
    # two-pass BatchNorm (per-channel sum/sumsq VMEM scratch + pl.when init/finalize, second
    # normalize pass), dimension_semantics=("parallel", ...) so rows pipeline the HBM DMA and
    # shard across v7x's 2 TensorCores; this all-resident form is sized for small U-Net tiles.
    out2d = pl.pallas_call(
        kernel,
        out_shape=jax.ShapeDtypeStruct((R2, C2), jnp.float32),
        in_specs=[vmem] * 7,
        out_specs=vmem,
        scratch_shapes=[pltpu.VMEM((R0, Cin), jnp.bfloat16),   # pooled slab (conv1 input)
                        pltpu.VMEM((R1, C1), jnp.bfloat16)],   # conv1 output (conv2 input)
        compiler_params=pltpu.CompilerParams(vmem_limit_bytes=vmem_limit),
    )(x2d, w1p, w2p, p1, p2, m1, m2)

    # pad dropped tail rows, reshape back to NCHW, slice out valid spatial rows (XLA glue)
    out_full = jnp.concatenate([out2d, jnp.zeros((R0 - R2, C2), out2d.dtype)], axis=0)
    out = out_full.reshape(N, Hp, Wp, C2)[:, :OH2, :OW2, :]
    return out.transpose(0, 3, 1, 2)


# ---------------------------------------------------------------------------
# pure-JAX reference (for correctness check)
# ---------------------------------------------------------------------------
def _reference(x, w1, b1, g1, be1, w2, b2, g2, be2, quantize=False):
    # quantize=True mirrors the kernel's bf16 quantization points (conv inputs + weights,
    # f32 accumulation).
    q = (lambda a: jnp.asarray(a, jnp.bfloat16)) if quantize \
        else (lambda a: jnp.asarray(a, jnp.float32))
    N, C, H, W = x.shape
    xp = x.reshape(N, C, H // 2, 2, W // 2, 2).max(axis=(3, 5))

    def block(h, w, b, g, beta):
        y = jax.lax.conv_general_dilated(
            q(h), q(w), (1, 1), 'VALID',
            dimension_numbers=('NCHW', 'OIHW', 'NCHW'),
            preferred_element_type=jnp.float32)
        y = y + b[None, :, None, None]
        mean = y.mean(axis=(0, 2, 3), keepdims=True)
        var = ((y - mean) ** 2).mean(axis=(0, 2, 3), keepdims=True)
        y = (y - mean) * jax.lax.rsqrt(var + EPS)
        y = y * g[None, :, None, None] + beta[None, :, None, None]
        return jnp.maximum(y, 0.0)

    h = block(xp, w1, b1, g1, be1)
    h = block(h, w2, b2, g2, be2)
    return h


if __name__ == "__main__":
    key = jax.random.PRNGKey(0)
    N, Cin, H, W = 2, 4, 16, 16
    Cout = 8
    ks = jax.random.split(key, 9)
    x = jax.random.normal(ks[0], (N, Cin, H, W), jnp.float32)
    w1 = 0.2 * jax.random.normal(ks[1], (Cout, Cin, 3, 3), jnp.float32)
    b1 = 0.1 * jax.random.normal(ks[2], (Cout,), jnp.float32)
    g1 = 1.0 + 0.1 * jax.random.normal(ks[3], (Cout,), jnp.float32)
    be1 = 0.1 * jax.random.normal(ks[4], (Cout,), jnp.float32)
    w2 = 0.2 * jax.random.normal(ks[5], (Cout, Cout, 3, 3), jnp.float32)
    b2 = 0.1 * jax.random.normal(ks[6], (Cout,), jnp.float32)
    g2 = 1.0 + 0.1 * jax.random.normal(ks[7], (Cout,), jnp.float32)
    be2 = 0.1 * jax.random.normal(ks[8], (Cout,), jnp.float32)

    out = jax.block_until_ready(down_scale(x, w1, b1, g1, be1, w2, b2, g2, be2))
    assert out.shape == (N, Cout, H // 2 - 4, W // 2 - 4), out.shape
    out_np = np.asarray(out)

    # tight check: same-algorithm reference with matching bf16 quantization points
    ref_q = np.asarray(_reference(x, w1, b1, g1, be1, w2, b2, g2, be2, quantize=True))
    assert np.allclose(out_np, ref_q, atol=2e-3, rtol=2e-3), float(np.max(np.abs(out_np - ref_q)))

    # loose check: full-f32 reference (bf16 weights/activations approximation error)
    ref_f = np.asarray(_reference(x, w1, b1, g1, be1, w2, b2, g2, be2, quantize=False))
    assert np.allclose(out_np, ref_f, atol=1e-1, rtol=1e-1), float(np.max(np.abs(out_np - ref_f)))

    print("KERNEL_OK")
</pallas_src>

<mosaic_0001>
module attributes {stable_mosaic.version = 11 : i64} {
  func.func @kernel(%arg0: memref<128x16xbf16, #tpu.memory_space<vmem>>, %arg1: memref<9x4x8xbf16, #tpu.memory_space<vmem>>, %arg2: memref<9x8x8xbf16, #tpu.memory_space<vmem>>, %arg3: memref<3x8xf32, #tpu.memory_space<vmem>>, %arg4: memref<3x8xf32, #tpu.memory_space<vmem>>, %arg5: memref<110x1xf32, #tpu.memory_space<vmem>>, %arg6: memref<92x1xf32, #tpu.memory_space<vmem>>, %arg7: memref<92x8xf32, #tpu.memory_space<vmem>>, %arg8: memref<128x4xbf16, #tpu.memory_space<vmem>>, %arg9: memref<110x8xbf16, #tpu.memory_space<vmem>>) attributes {dimension_semantics = [], scalar_prefetch = 0 : i64, scratch_operands = 2 : i64, tpu.core_type = #tpu.core_type<tc>} {
    %c0 = arith.constant 0 : index
    %c0_0 = arith.constant 0 : index
    %0 = vector.load %arg0[%c0, %c0_0] : memref<128x16xbf16, #tpu.memory_space<vmem>>, vector<128x16xbf16>
    %1 = vector.extract_strided_slice %0 {offsets = [0, 0], sizes = [128, 4], strides = [1, 1]} : vector<128x16xbf16> to vector<128x4xbf16>
    %2 = vector.extract_strided_slice %0 {offsets = [0, 4], sizes = [128, 4], strides = [1, 1]} : vector<128x16xbf16> to vector<128x4xbf16>
    %3 = arith.maximumf %1, %2 : vector<128x4xbf16>
    %4 = vector.extract_strided_slice %0 {offsets = [0, 8], sizes = [128, 4], strides = [1, 1]} : vector<128x16xbf16> to vector<128x4xbf16>
    %5 = vector.extract_strided_slice %0 {offsets = [0, 12], sizes = [128, 4], strides = [1, 1]} : vector<128x16xbf16> to vector<128x4xbf16>
    %6 = arith.maximumf %4, %5 : vector<128x4xbf16>
    %7 = arith.maximumf %3, %6 : vector<128x4xbf16>
    %c0_1 = arith.constant 0 : index
    %c0_2 = arith.constant 0 : index
    %8 = vector.load %arg8[%c0_1, %c0_2] : memref<128x4xbf16, #tpu.memory_space<vmem>>, vector<128x4xbf16>
    tpu.vector_store %arg8[%c0_1, %c0_2], %7 {strides = array<i32>} : memref<128x4xbf16, #tpu.memory_space<vmem>>, vector<128x4xbf16>,
    %cst = arith.constant 0.000000e+00 : f32
    %9 = vector.broadcast %cst : f32 to vector<110x8xf32>
    %c0_3 = arith.constant 0 : index
    %c0_4 = arith.constant 0 : index
    %10 = vector.load %arg8[%c0_3, %c0_4] : memref<128x4xbf16, #tpu.memory_space<vmem>>, vector<110x4xbf16>
    %c0_5 = arith.constant 0 : index
    %c0_6 = arith.constant 0 : index
    %c0_7 = arith.constant 0 : index
    %11 = vector.load %arg1[%c0_5, %c0_6, %c0_7] : memref<9x4x8xbf16, #tpu.memory_space<vmem>>, vector<1x4x8xbf16>
    %12 = vector.shape_cast %11 : vector<1x4x8xbf16> to vector<4x8xbf16>
    %cst_8 = arith.constant dense<0.000000e+00> : vector<110x8xf32>
    %13 = tpu.matmul %10, %12, %cst_8 {dimension_numbers = #tpu.dot_dimension_numbers<[1], [0], [0], [1], [0, 0, 1, 1], [], []>} : vector<110x4xbf16>, vector<4x8xbf16>, vector<110x8xf32> -> vector<110x8xf32>
    %14 = arith.addf %9, %13 : vector<110x8xf32>
    %c1 = arith.constant 1 : index
    %c0_9 = arith.constant 0 : index
    %15 = vector.load %arg8[%c1, %c0_9] : memref<128x4xbf16, #tpu.memory_space<vmem>>, vector<110x4xbf16>
    %c1_10 = arith.constant 1 : index
    %c0_11 = arith.constant 0 : index
    %c0_12 = arith.constant 0 : index
    %16 = vector.load %arg1[%c1_10, %c0_11, %c0_12] : memref<9x4x8xbf16, #tpu.memory_space<vmem>>, vector<1x4x8xbf16>
    %17 = vector.shape_cast %16 : vector<1x4x8xbf16> to vector<4x8xbf16>
    %cst_13 = arith.constant dense<0.000000e+00> : vector<110x8xf32>
    %18 = tpu.matmul %15, %17, %cst_13 {dimension_numbers = #tpu.dot_dimension_numbers<[1], [0], [0], [1], [0, 0, 1, 1], [], []>} : vector<110x4xbf16>, vector<4x8xbf16>, vector<110x8xf32> -> vector<110x8xf32>
    %19 = arith.addf %14, %18 : vector<110x8xf32>
    %c2 = arith.constant 2 : index
    %c0_14 = arith.constant 0 : index
    %20 = vector.load %arg8[%c2, %c0_14] : memref<128x4xbf16, #tpu.memory_space<vmem>>, vector<110x4xbf16>
    %c2_15 = arith.constant 2 : index
    %c0_16 = arith.constant 0 : index
    %c0_17 = arith.constant 0 : index
    %21 = vector.load %arg1[%c2_15, %c0_16, %c0_17] : memref<9x4x8xbf16, #tpu.memory_space<vmem>>, vector<1x4x8xbf16>
    %22 = vector.shape_cast %21 : vector<1x4x8xbf16> to vector<4x8xbf16>
    %cst_18 = arith.constant dense<0.000000e+00> : vector<110x8xf32>
    %23 = tpu.matmul %20, %22, %cst_18 {dimension_numbers = #tpu.dot_dimension_numbers<[1], [0], [0], [1], [0, 0, 1, 1], [], []>} : vector<110x4xbf16>, vector<4x8xbf16>, vector<110x8xf32> -> vector<110x8xf32>
    %24 = arith.addf %19, %23 : vector<110x8xf32>
    %c8 = arith.constant 8 : index
    %c0_19 = arith.constant 0 : index
    %25 = vector.load %arg8[%c8, %c0_19] : memref<128x4xbf16, #tpu.memory_space<vmem>>, vector<110x4xbf16>
    %c3 = arith.constant 3 : index
    %c0_20 = arith.constant 0 : index
    %c0_21 = arith.constant 0 : index
    %26 = vector.load %arg1[%c3, %c0_20, %c0_21] : memref<9x4x8xbf16, #tpu.memory_space<vmem>>, vector<1x4x8xbf16>
    %27 = vector.shape_cast %26 : vector<1x4x8xbf16> to vector<4x8xbf16>
    %cst_22 = arith.constant dense<0.000000e+00> : vector<110x8xf32>
    %28 = tpu.matmul %25, %27, %cst_22 {dimension_numbers = #tpu.dot_dimension_numbers<[1], [0], [0], [1], [0, 0, 1, 1], [], []>} : vector<110x4xbf16>, vector<4x8xbf16>, vector<110x8xf32> -> vector<110x8xf32>
    %29 = arith.addf %24, %28 : vector<110x8xf32>
    %c9 = arith.constant 9 : index
    %c0_23 = arith.constant 0 : index
    %30 = vector.load %arg8[%c9, %c0_23] : memref<128x4xbf16, #tpu.memory_space<vmem>>, vector<110x4xbf16>
    %c4 = arith.constant 4 : index
    %c0_24 = arith.constant 0 : index
    %c0_25 = arith.constant 0 : index
    %31 = vector.load %arg1[%c4, %c0_24, %c0_25] : memref<9x4x8xbf16, #tpu.memory_space<vmem>>, vector<1x4x8xbf16>
    %32 = vector.shape_cast %31 : vector<1x4x8xbf16> to vector<4x8xbf16>
    %cst_26 = arith.constant dense<0.000000e+00> : vector<110x8xf32>
    %33 = tpu.matmul %30, %32, %cst_26 {dimension_numbers = #tpu.dot_dimension_numbers<[1], [0], [0], [1], [0, 0, 1, 1], [], []>} : vector<110x4xbf16>, vector<4x8xbf16>, vector<110x8xf32> -> vector<110x8xf32>
    %34 = arith.addf %29, %33 : vector<110x8xf32>
    %c10 = arith.constant 10 : index
    %c0_27 = arith.constant 0 : index
    %35 = vector.load %arg8[%c10, %c0_27] : memref<128x4xbf16, #tpu.memory_space<vmem>>, vector<110x4xbf16>
    %c5 = arith.constant 5 : index
    %c0_28 = arith.constant 0 : index
    %c0_29 = arith.constant 0 : index
    %36 = vector.load %arg1[%c5, %c0_28, %c0_29] : memref<9x4x8xbf16, #tpu.memory_space<vmem>>, vector<1x4x8xbf16>
    %37 = vector.shape_cast %36 : vector<1x4x8xbf16> to vector<4x8xbf16>
    %cst_30 = arith.constant dense<0.000000e+00> : vector<110x8xf32>
    %38 = tpu.matmul %35, %37, %cst_30 {dimension_numbers = #tpu.dot_dimension_numbers<[1], [0], [0], [1], [0, 0, 1, 1], [], []>} : vector<110x4xbf16>, vector<4x8xbf16>, vector<110x8xf32> -> vector<110x8xf32>
    %39 = arith.addf %34, %38 : vector<110x8xf32>
    %c16 = arith.constant 16 : index
    %c0_31 = arith.constant 0 : index
    %40 = vector.load %arg8[%c16, %c0_31] : memref<128x4xbf16, #tpu.memory_space<vmem>>, vector<110x4xbf16>
    %c6 = arith.constant 6 : index
    %c0_32 = arith.constant 0 : index
    %c0_33 = arith.constant 0 : index
    %41 = vector.load %arg1[%c6, %c0_32, %c0_33] : memref<9x4x8xbf16, #tpu.memory_space<vmem>>, vector<1x4x8xbf16>
    %42 = vector.shape_cast %41 : vector<1x4x8xbf16> to vector<4x8xbf16>
    %cst_34 = arith.constant dense<0.000000e+00> : vector<110x8xf32>
    %43 = tpu.matmul %40, %42, %cst_34 {dimension_numbers = #tpu.dot_dimension_numbers<[1], [0], [0], [1], [0, 0, 1, 1], [], []>} : vector<110x4xbf16>, vector<4x8xbf16>, vector<110x8xf32> -> vector<110x8xf32>
    %44 = arith.addf %39, %43 : vector<110x8xf32>
    %c17 = arith.constant 17 : index
    %c0_35 = arith.constant 0 : index
    %45 = vector.load %arg8[%c17, %c0_35] : memref<128x4xbf16, #tpu.memory_space<vmem>>, vector<110x4xbf16>
    %c7 = arith.constant 7 : index
    %c0_36 = arith.constant 0 : index
    %c0_37 = arith.constant 0 : index
    %46 = vector.load %arg1[%c7, %c0_36, %c0_37] : memref<9x4x8xbf16, #tpu.memory_space<vmem>>, vector<1x4x8xbf16>
    %47 = vector.shape_cast %46 : vector<1x4x8xbf16> to vector<4x8xbf16>
    %cst_38 = arith.constant dense<0.000000e+00> : vector<110x8xf32>
    %48 = tpu.matmul %45, %47, %cst_38 {dimension_numbers = #tpu.dot_dimension_numbers<[1], [0], [0], [1], [0, 0, 1, 1], [], []>} : vector<110x4xbf16>, vector<4x8xbf16>, vector<110x8xf32> -> vector<110x8xf32>
    %49 = arith.addf %44, %48 : vector<110x8xf32>
    %c18 = arith.constant 18 : index
    %c0_39 = arith.constant 0 : index
    %50 = vector.load %arg8[%c18, %c0_39] : memref<128x4xbf16, #tpu.memory_space<vmem>>, vector<110x4xbf16>
    %c8_40 = arith.constant 8 : index
    %c0_41 = arith.constant 0 : index
    %c0_42 = arith.constant 0 : index
    %51 = vector.load %arg1[%c8_40, %c0_41, %c0_42] : memref<9x4x8xbf16, #tpu.memory_space<vmem>>, vector<1x4x8xbf16>
    %52 = vector.shape_cast %51 : vector<1x4x8xbf16> to vector<4x8xbf16>
    %cst_43 = arith.constant dense<0.000000e+00> : vector<110x8xf32>
    %53 = tpu.matmul %50, %52, %cst_43 {dimension_numbers = #tpu.dot_dimension_numbers<[1], [0], [0], [1], [0, 0, 1, 1], [], []>} : vector<110x4xbf16>, vector<4x8xbf16>, vector<110x8xf32> -> vector<110x8xf32>
    %54 = arith.addf %49, %53 : vector<110x8xf32>
    %c0_44 = arith.constant 0 : index
    %c0_45 = arith.constant 0 : index
    %55 = vector.load %arg5[%c0_44, %c0_45] : memref<110x1xf32, #tpu.memory_space<vmem>>, vector<110x1xf32>
    %c0_46 = arith.constant 0 : index
    %c0_47 = arith.constant 0 : index
    %56 = vector.load %arg3[%c0_46, %c0_47] : memref<3x8xf32, #tpu.memory_space<vmem>>, vector<1x8xf32>
    %57 = vector.broadcast %56 : vector<1x8xf32> to vector<110x8xf32>
    %58 = arith.addf %54, %57 : vector<110x8xf32>
    %59 = vector.broadcast %55 : vector<110x1xf32> to vector<110x8xf32>
    %60 = arith.mulf %58, %59 : vector<110x8xf32>
    %cst_48 = arith.constant dense<0.000000e+00> : vector<8xf32>
    %61 = vector.multi_reduction <add>, %60, %cst_48 [0] : vector<110x8xf32> to vector<8xf32>
    %62 = vector.shape_cast %61 : vector<8xf32> to vector<1x8xf32>
    %63 = arith.mulf %58, %58 : vector<110x8xf32>
    %64 = vector.broadcast %55 : vector<110x1xf32> to vector<110x8xf32>
    %65 = arith.mulf %63, %64 : vector<110x8xf32>
    %cst_49 = arith.constant dense<0.000000e+00> : vector<8xf32>
    %66 = vector.multi_reduction <add>, %65, %cst_49 [0] : vector<110x8xf32> to vector<8xf32>
    %67 = vector.shape_cast %66 : vector<8xf32> to vector<1x8xf32>
    %cst_50 = arith.constant 0.013888889 : f32
    %68 = vector.broadcast %cst_50 : f32 to vector<1x8xf32>
    %69 = arith.mulf %62, %68 : vector<1x8xf32>
    %cst_51 = arith.constant 0.013888889 : f32
    %70 = vector.broadcast %cst_51 : f32 to vector<1x8xf32>
    %71 = arith.mulf %67, %70 : vector<1x8xf32>
    %72 = arith.mulf %69, %69 : vector<1x8xf32>
    %73 = arith.subf %71, %72 : vector<1x8xf32>
    %cst_52 = arith.constant 0.000000e+00 : f32
    %74 = vector.broadcast %cst_52 : f32 to vector<1x8xf32>
    %75 = arith.maximumf %73, %74 : vector<1x8xf32>
    %c1_53 = arith.constant 1 : index
    %c0_54 = arith.constant 0 : index
    %76 = vector.load %arg3[%c1_53, %c0_54] : memref<3x8xf32, #tpu.memory_space<vmem>>, vector<1x8xf32>
    %cst_55 = arith.constant 9.99999974E-6 : f32
    %77 = vector.broadcast %cst_55 : f32 to vector<1x8xf32>
    %78 = arith.addf %75, %77 : vector<1x8xf32>
    %79 = math.rsqrt %78 : vector<1x8xf32>
    %80 = arith.mulf %76, %79 : vector<1x8xf32>
    %c2_56 = arith.constant 2 : index
    %c0_57 = arith.constant 0 : index
    %81 = vector.load %arg3[%c2_56, %c0_57] : memref<3x8xf32, #tpu.memory_space<vmem>>, vector<1x8xf32>
    %82 = arith.mulf %80, %69 : vector<1x8xf32>
    %83 = arith.subf %81, %82 : vector<1x8xf32>
    %84 = vector.broadcast %80 : vector<1x8xf32> to vector<110x8xf32>
    %85 = arith.mulf %58, %84 : vector<110x8xf32>
    %86 = vector.broadcast %83 : vector<1x8xf32> to vector<110x8xf32>
    %87 = arith.addf %85, %86 : vector<110x8xf32>
    %cst_58 = arith.constant 0.000000e+00 : f32
    %88 = vector.broadcast %cst_58 : f32 to vector<110x8xf32>
    %89 = arith.maximumf %87, %88 : vector<110x8xf32>
    %90 = arith.truncf %89 : vector<110x8xf32> to vector<110x8xbf16>
    %c0_59 = arith.constant 0 : index
    %c0_60 = arith.constant 0 : index
    %91 = vector.load %arg9[%c0_59, %c0_60] : memref<110x8xbf16, #tpu.memory_space<vmem>>, vector<110x8xbf16>
    tpu.vector_store %arg9[%c0_59, %c0_60], %90 {strides = array<i32>} : memref<110x8xbf16, #tpu.memory_space<vmem>>, vector<110x8xbf16>,
    %cst_61 = arith.constant 0.000000e+00 : f32
    %92 = vector.broadcast %cst_61 : f32 to vector<92x8xf32>
    %c0_62 = arith.constant 0 : index
    %c0_63 = arith.constant 0 : index
    %93 = vector.load %arg9[%c0_62, %c0_63] : memref<110x8xbf16, #tpu.memory_space<vmem>>, vector<92x8xbf16>
    %c0_64 = arith.constant 0 : index
    %c0_65 = arith.constant 0 : index
    %c0_66 = arith.constant 0 : index
    %94 = vector.load %arg2[%c0_64, %c0_65, %c0_66] : memref<9x8x8xbf16, #tpu.memory_space<vmem>>, vector<1x8x8xbf16>
    %95 = vector.shape_cast %94 : vector<1x8x8xbf16> to vector<8x8xbf16>
    %cst_67 = arith.constant dense<0.000000e+00> : vector<92x8xf32>
    %96 = tpu.matmul %93, %95, %cst_67 {dimension_numbers = #tpu.dot_dimension_numbers<[1], [0], [0], [1], [0, 0, 1, 1], [], []>} : vector<92x8xbf16>, vector<8x8xbf16>, vector<92x8xf32> -> vector<92x8xf32>
    %97 = arith.addf %92, %96 : vector<92x8xf32>
    %c1_68 = arith.constant 1 : index
    %c0_69 = arith.constant 0 : index
    %98 = vector.load %arg9[%c1_68, %c0_69] : memref<110x8xbf16, #tpu.memory_space<vmem>>, vector<92x8xbf16>
    %c1_70 = arith.constant 1 : index
    %c0_71 = arith.constant 0 : index
    %c0_72 = arith.constant 0 : index
    %99 = vector.load %arg2[%c1_70, %c0_71, %c0_72] : memref<9x8x8xbf16, #tpu.memory_space<vmem>>, vector<1x8x8xbf16>
    %100 = vector.shape_cast %99 : vector<1x8x8xbf16> to vector<8x8xbf16>
    %cst_73 = arith.constant dense<0.000000e+00> : vector<92x8xf32>
    %101 = tpu.matmul %98, %100, %cst_73 {dimension_numbers = #tpu.dot_dimension_numbers<[1], [0], [0], [1], [0, 0, 1, 1], [], []>} : vector<92x8xbf16>, vector<8x8xbf16>, vector<92x8xf32> -> vector<92x8xf32>
    %102 = arith.addf %97, %101 : vector<92x8xf32>
    %c2_74 = arith.constant 2 : index
    %c0_75 = arith.constant 0 : index
    %103 = vector.load %arg9[%c2_74, %c0_75] : memref<110x8xbf16, #tpu.memory_space<vmem>>, vector<92x8xbf16>
    %c2_76 = arith.constant 2 : index
    %c0_77 = arith.constant 0 : index
    %c0_78 = arith.constant 0 : index
    %104 = vector.load %arg2[%c2_76, %c0_77, %c0_78] : memref<9x8x8xbf16, #tpu.memory_space<vmem>>, vector<1x8x8xbf16>
    %105 = vector.shape_cast %104 : vector<1x8x8xbf16> to vector<8x8xbf16>
    %cst_79 = arith.constant dense<0.000000e+00> : vector<92x8xf32>
    %106 = tpu.matmul %103, %105, %cst_79 {dimension_numbers = #tpu.dot_dimension_numbers<[1], [0], [0], [1], [0, 0, 1, 1], [], []>} : vector<92x8xbf16>, vector<8x8xbf16>, vector<92x8xf32> -> vector<92x8xf32>
    %107 = arith.addf %102, %106 : vector<92x8xf32>
    %c8_80 = arith.constant 8 : index
    %c0_81 = arith.constant 0 : index
    %108 = vector.load %arg9[%c8_80, %c0_81] : memref<110x8xbf16, #tpu.memory_space<vmem>>, vector<92x8xbf16>
    %c3_82 = arith.constant 3 : index
    %c0_83 = arith.constant 0 : index
    %c0_84 = arith.constant 0 : index
    %109 = vector.load %arg2[%c3_82, %c0_83, %c0_84] : memref<9x8x8xbf16, #tpu.memory_space<vmem>>, vector<1x8x8xbf16>
    %110 = vector.shape_cast %109 : vector<1x8x8xbf16> to vector<8x8xbf16>
    %cst_85 = arith.constant dense<0.000000e+00> : vector<92x8xf32>
    %111 = tpu.matmul %108, %110, %cst_85 {dimension_numbers = #tpu.dot_dimension_numbers<[1], [0], [0], [1], [0, 0, 1, 1], [], []>} : vector<92x8xbf16>, vector<8x8xbf16>, vector<92x8xf32> -> vector<92x8xf32>
    %112 = arith.addf %107, %111 : vector<92x8xf32>
    %c9_86 = arith.constant 9 : index
    %c0_87 = arith.constant 0 : index
    %113 = vector.load %arg9[%c9_86, %c0_87] : memref<110x8xbf16, #tpu.memory_space<vmem>>, vector<92x8xbf16>
    %c4_88 = arith.constant 4 : index
    %c0_89 = arith.constant 0 : index
    %c0_90 = arith.constant 0 : index
    %114 = vector.load %arg2[%c4_88, %c0_89, %c0_90] : memref<9x8x8xbf16, #tpu.memory_space<vmem>>, vector<1x8x8xbf16>
    %115 = vector.shape_cast %114 : vector<1x8x8xbf16> to vector<8x8xbf16>
    %cst_91 = arith.constant dense<0.000000e+00> : vector<92x8xf32>
    %116 = tpu.matmul %113, %115, %cst_91 {dimension_numbers = #tpu.dot_dimension_numbers<[1], [0], [0], [1], [0, 0, 1, 1], [], []>} : vector<92x8xbf16>, vector<8x8xbf16>, vector<92x8xf32> -> vector<92x8xf32>
    %117 = arith.addf %112, %116 : vector<92x8xf32>
    %c10_92 = arith.constant 10 : index
    %c0_93 = arith.constant 0 : index
    %118 = vector.load %arg9[%c10_92, %c0_93] : memref<110x8xbf16, #tpu.memory_space<vmem>>, vector<92x8xbf16>
    %c5_94 = arith.constant 5 : index
    %c0_95 = arith.constant 0 : index
    %c0_96 = arith.constant 0 : index
    %119 = vector.load %arg2[%c5_94, %c0_95, %c0_96] : memref<9x8x8xbf16, #tpu.memory_space<vmem>>, vector<1x8x8xbf16>
    %120 = vector.shape_cast %119 : vector<1x8x8xbf16> to vector<8x8xbf16>
    %cst_97 = arith.constant dense<0.000000e+00> : vector<92x8xf32>
    %121 = tpu.matmul %118, %120, %cst_97 {dimension_numbers = #tpu.dot_dimension_numbers<[1], [0], [0], [1], [0, 0, 1, 1], [], []>} : vector<92x8xbf16>, vector<8x8xbf16>, vector<92x8xf32> -> vector<92x8xf32>
    %122 = arith.addf %117, %121 : vector<92x8xf32>
    %c16_98 = arith.constant 16 : index
    %c0_99 = arith.constant 0 : index
    %123 = vector.load %arg9[%c16_98, %c0_99] : memref<110x8xbf16, #tpu.memory_space<vmem>>, vector<92x8xbf16>
    %c6_100 = arith.constant 6 : index
    %c0_101 = arith.constant 0 : index
    %c0_102 = arith.constant 0 : index
    %124 = vector.load %arg2[%c6_100, %c0_101, %c0_102] : memref<9x8x8xbf16, #tpu.memory_space<vmem>>, vector<1x8x8xbf16>
    %125 = vector.shape_cast %124 : vector<1x8x8xbf16> to vector<8x8xbf16>
    %cst_103 = arith.constant dense<0.000000e+00> : vector<92x8xf32>
    %126 = tpu.matmul %123, %125, %cst_103 {dimension_numbers = #tpu.dot_dimension_numbers<[1], [0], [0], [1], [0, 0, 1, 1], [], []>} : vector<92x8xbf16>, vector<8x8xbf16>, vector<92x8xf32> -> vector<92x8xf32>
    %127 = arith.addf %122, %126 : vector<92x8xf32>
    %c17_104 = arith.constant 17 : index
    %c0_105 = arith.constant 0 : index
    %128 = vector.load %arg9[%c17_104, %c0_105] : memref<110x8xbf16, #tpu.memory_space<vmem>>, vector<92x8xbf16>
    %c7_106 = arith.constant 7 : index
    %c0_107 = arith.constant 0 : index
    %c0_108 = arith.constant 0 : index
    %129 = vector.load %arg2[%c7_106, %c0_107, %c0_108] : memref<9x8x8xbf16, #tpu.memory_space<vmem>>, vector<1x8x8xbf16>
    %130 = vector.shape_cast %129 : vector<1x8x8xbf16> to vector<8x8xbf16>
    %cst_109 = arith.constant dense<0.000000e+00> : vector<92x8xf32>
    %131 = tpu.matmul %128, %130, %cst_109 {dimension_numbers = #tpu.dot_dimension_numbers<[1], [0], [0], [1], [0, 0, 1, 1], [], []>} : vector<92x8xbf16>, vector<8x8xbf16>, vector<92x8xf32> -> vector<92x8xf32>
    %132 = arith.addf %127, %131 : vector<92x8xf32>
    %c18_110 = arith.constant 18 : index
    %c0_111 = arith.constant 0 : index
    %133 = vector.load %arg9[%c18_110, %c0_111] : memref<110x8xbf16, #tpu.memory_space<vmem>>, vector<92x8xbf16>
    %c8_112 = arith.constant 8 : index
    %c0_113 = arith.constant 0 : index
    %c0_114 = arith.constant 0 : index
    %134 = vector.load %arg2[%c8_112, %c0_113, %c0_114] : memref<9x8x8xbf16, #tpu.memory_space<vmem>>, vector<1x8x8xbf16>
    %135 = vector.shape_cast %134 : vector<1x8x8xbf16> to vector<8x8xbf16>
    %cst_115 = arith.constant dense<0.000000e+00> : vector<92x8xf32>
    %136 = tpu.matmul %133, %135, %cst_115 {dimension_numbers = #tpu.dot_dimension_numbers<[1], [0], [0], [1], [0, 0, 1, 1], [], []>} : vector<92x8xbf16>, vector<8x8xbf16>, vector<92x8xf32> -> vector<92x8xf32>
    %137 = arith.addf %132, %136 : vector<92x8xf32>
    %c0_116 = arith.constant 0 : index
    %c0_117 = arith.constant 0 : index
    %138 = vector.load %arg6[%c0_116, %c0_117] : memref<92x1xf32, #tpu.memory_space<vmem>>, vector<92x1xf32>
    %c0_118 = arith.constant 0 : index
    %c0_119 = arith.constant 0 : index
    %139 = vector.load %arg4[%c0_118, %c0_119] : memref<3x8xf32, #tpu.memory_space<vmem>>, vector<1x8xf32>
    %140 = vector.broadcast %139 : vector<1x8xf32> to vector<92x8xf32>
    %141 = arith.addf %137, %140 : vector<92x8xf32>
    %142 = vector.broadcast %138 : vector<92x1xf32> to vector<92x8xf32>
    %143 = arith.mulf %141, %142 : vector<92x8xf32>
    %cst_120 = arith.constant dense<0.000000e+00> : vector<8xf32>
    %144 = vector.multi_reduction <add>, %143, %cst_120 [0] : vector<92x8xf32> to vector<8xf32>
    %145 = vector.shape_cast %144 : vector<8xf32> to vector<1x8xf32>
    %146 = arith.mulf %141, %141 : vector<92x8xf32>
    %147 = vector.broadcast %138 : vector<92x1xf32> to vector<92x8xf32>
    %148 = arith.mulf %146, %147 : vector<92x8xf32>
    %cst_121 = arith.constant dense<0.000000e+00> : vector<8xf32>
    %149 = vector.multi_reduction <add>, %148, %cst_121 [0] : vector<92x8xf32> to vector<8xf32>
    %150 = vector.shape_cast %149 : vector<8xf32> to vector<1x8xf32>
    %cst_122 = arith.constant 3.125000e-02 : f32
    %151 = vector.broadcast %cst_122 : f32 to vector<1x8xf32>
    %152 = arith.mulf %145, %151 : vector<1x8xf32>
    %cst_123 = arith.constant 3.125000e-02 : f32
    %153 = vector.broadcast %cst_123 : f32 to vector<1x8xf32>
    %154 = arith.mulf %150, %153 : vector<1x8xf32>
    %155 = arith.mulf %152, %152 : vector<1x8xf32>
    %156 = arith.subf %154, %155 : vector<1x8xf32>
    %cst_124 = arith.constant 0.000000e+00 : f32
    %157 = vector.broadcast %cst_124 : f32 to vector<1x8xf32>
    %158 = arith.maximumf %156, %157 : vector<1x8xf32>
    %c1_125 = arith.constant 1 : index
    %c0_126 = arith.constant 0 : index
    %159 = vector.load %arg4[%c1_125, %c0_126] : memref<3x8xf32, #tpu.memory_space<vmem>>, vector<1x8xf32>
    %cst_127 = arith.constant 9.99999974E-6 : f32
    %160 = vector.broadcast %cst_127 : f32 to vector<1x8xf32>
    %161 = arith.addf %158, %160 : vector<1x8xf32>
    %162 = math.rsqrt %161 : vector<1x8xf32>
    %163 = arith.mulf %159, %162 : vector<1x8xf32>
    %c2_128 = arith.constant 2 : index
    %c0_129 = arith.constant 0 : index
    %164 = vector.load %arg4[%c2_128, %c0_129] : memref<3x8xf32, #tpu.memory_space<vmem>>, vector<1x8xf32>
    %165 = arith.mulf %163, %152 : vector<1x8xf32>
    %166 = arith.subf %164, %165 : vector<1x8xf32>
    %167 = vector.broadcast %163 : vector<1x8xf32> to vector<92x8xf32>
    %168 = arith.mulf %141, %167 : vector<92x8xf32>
    %169 = vector.broadcast %166 : vector<1x8xf32> to vector<92x8xf32>
    %170 = arith.addf %168, %169 : vector<92x8xf32>
    %cst_130 = arith.constant 0.000000e+00 : f32
    %171 = vector.broadcast %cst_130 : f32 to vector<92x8xf32>
    %172 = arith.maximumf %170, %171 : vector<92x8xf32>
    %c0_131 = arith.constant 0 : index
    %c0_132 = arith.constant 0 : index
    %173 = vector.load %arg7[%c0_131, %c0_132] : memref<92x8xf32, #tpu.memory_space<vmem>>, vector<92x8xf32>
    tpu.vector_store %arg7[%c0_131, %c0_132], %172 {strides = array<i32>} : memref<92x8xf32, #tpu.memory_space<vmem>>, vector<92x8xf32>,
    return
  }
}

</mosaic_0001>

<bundles_post_ra>
// kernel: tpu_custom_call.1
= control target key start
LH: loop header
LB: loop body
LE: loop exit
PB: predicated region body
PF: predicated region fallthrough
CT: control target
= control target key end

     0   :  { %s3330_s9 = smov 124   ;;  %s3331_s14 = smov 120   ;;  %vm415_vm0 = vcmask 1041408   ;;  %vm267_vm1 = vcmask 27648   ;;  %vm393_vm2 = vcmask 31744   ;;  %vm534_vm4 = vcmask 1046528   ;;  %s4613_s0 = inlined_call_operand.vmem [shape: bf16[128,16], index: 0, kind: input, shape index: {}]   ;;  %s4614_s1 = inlined_call_operand.vmem [shape: bf16[9,4,8], index: 1, kind: input, shape index: {}]   ;;  %s4615_s5 = inlined_call_operand.vmem [shape: f32[110,1], index: 5, kind: input, shape index: {}]   ;;  %s4616_s3 = inlined_call_operand.vmem [shape: f32[3,8], index: 3, kind: input, shape index: {}]   ;;  %s4617_s6 = inlined_call_operand.vmem [shape: f32[92,1], index: 6, kind: input, shape index: {}]   ;;  %s4618_s2 = inlined_call_operand.vmem [shape: bf16[9,8,8], index: 2, kind: input, shape index: {}]   ;;  %s4619_s4 = inlined_call_operand.vmem [shape: f32[3,8], index: 4, kind: input, shape index: {}]   ;;  %s4620_s7 = inlined_call_operand.vmem [shape: f32[92,8], index: 7, kind: output, shape index: {}]  }
   0x1   :  { %v3204_v0 = vld [vmem:[%s4613_s0 + $0x10] sm:$0xff]   ;;  %v3152_v1 = vld [vmem:[%s4613_s0] sm:$0xff]   ;;  %v3205_v6 = vld [vmem:[%s4613_s0 + $0x18] sm:$0xff]   ;;  %vm337_vm3 = vsmask.f32 7424  ;;  %vm1788_vm5 = vcmask 1043456  }
   0x2   :  { %v3161_v2 = vunpack.c.l.bf16 %v3204_v0  ;;  %v3162_v3 = vunpack.c.h.bf16 %v3204_v0  ;;  %v3153_v4 = vunpack.c.l.bf16 %v3152_v1  ;;  %v3154_v5 = vunpack.c.h.bf16 %v3152_v1  ;;  %v3203_v7 = vld [vmem:[%s4613_s0 + $0x8] sm:$0xff]   ;;  %v3206_v16 = vld [vmem:[%s4613_s0 + $0x20] sm:$0xff]   ;;  %v3400_v36 = vld [vmem:[%s4613_s0 + $0x30] sm:$0xff]  }
   0x3   :  { %v3165_v10 = vunpack.c.l.bf16 %v3205_v6  ;;  %v3166_v11 = vunpack.c.h.bf16 %v3205_v6  ;;  %v3157_v12 = vunpack.c.l.bf16 %v3203_v7  ;;  %v3158_v13 = vunpack.c.h.bf16 %v3203_v7  ;;  %v3207_v49 = vld [vmem:[%s4613_s0 + $0x28] sm:$0xff]   ;;  %v3435_v58 = vld [vmem:[%s4613_s0 + $0x38] sm:$0xff]   ;;  %v298_v60 = vld [vmem:[%s4614_s1] sm:$0x3] }
   0x4   :  { %v3245_v8 = vpack.i.bf16 %v3162_v3, %v3161_v2  ;;  %v3235_v9 = vpack.i.bf16 %v3154_v5, %v3153_v4  ;;  %v3169_v17 = vunpack.c.l.bf16 %v3206_v16  ;;  %v3170_v18 = vunpack.c.h.bf16 %v3206_v16  ;;  %v2883_v62 = vld [vmem:[%s4614_s1 + $0x2] sm:$0x3]  ;;  %v2918_v16 = vld [vmem:[%s4614_s1 + $0x4] sm:$0x3] }
   0x5   :  { %v3250_v14 = vpack.i.bf16 %v3166_v11, %v3165_v10  ;;  %v3240_v15 = vpack.i.bf16 %v3158_v13, %v3157_v12  ;;  %v3177_v43 = vunpack.c.l.bf16 %v3400_v36  ;;  %v3178_v44 = vunpack.c.h.bf16 %v3400_v36 }
   0x6   :  { %3246 = vrot.lane.b32.xlu1 %v3245_v8, %s3330_s9  ;;  %3236 = vrot.lane.b32.xlu0 %v3235_v9, %s3330_s9  ;;  %v3265_v19 = vpack.i.bf16 %v3170_v18, %v3169_v17  ;;  %v3173_v52 = vunpack.c.l.bf16 %v3207_v49  ;;  %v3174_v53 = vunpack.c.h.bf16 %v3207_v49  ;;  %v3181_v59 = vunpack.c.l.bf16 %v3435_v58 }
   0x7   :  { %v3285_v45 = vpack.i.bf16 %v3178_v44, %v3177_v43  ;;  %v482_v61 = vsel %vm415_vm0, %v298_v60, 0  ;;  %v417_v63 = vsel %vm415_vm0, %v2883_v62, 0  ;;  %vm1486_vm6 = vcmask 64512  }
   0x8   :  { %v3275_v56 = vpack.i.bf16 %v3174_v53, %v3173_v52  ;;  %491 = vmatpush.bf16.msra.mxu1 %v482_v61  ;;  %3230 = vmatpush.bf16.msra.mxu3 %v482_v61  ;;  %vm1512_vm7 = vcmask 62464   ;;  %vm1675_vm11 = vcmask 59392   ;;  %vm1661_vm12 = vcmask 60416  }
   0x9   :  { %426 = vmatpush.bf16.msra.mxu0 %v417_v63 }
   0xe   :  { %3251 = vrot.lane.b32.xlu1 %v3250_v14, %s3330_s9  ;;  %3241 = vrot.lane.b32.xlu0 %v3240_v15, %s3330_s9 }
  0x16   :  { %3266 = vrot.lane.b32.xlu0 %v3265_v19, %s3330_s9  ;;  %v570_v19 = vsel %vm415_vm0, %v2918_v16, 0 }
  0x17   :  { %3231 = vmatpush.bf16.msra.mxu2 %v570_v19  ;;  %579 = vmatpush.bf16.msrb.mxu0 %v570_v19 }
  0x78   :  { %v3247_v20 = vpop.permute.xlu1 %3246  ;;  %v3237_v21 = vpop.permute.xlu0 %3236 }
  0x79   :  { %v3249_v22 = vunpack.i.h.bf16 %v3247_v20  ;;  %v3248_v23 = vunpack.i.l.bf16 %v3247_v20  ;;  %v3239_v24 = vunpack.i.h.bf16 %v3237_v21  ;;  %v3238_v25 = vunpack.i.l.bf16 %v3237_v21 }
  0x7b   :  { %v3393_v26 = vmax.f32 %v3162_v3, %v3249_v22  ;;  %v3395_v27 = vmax.f32 %v3161_v2, %v3248_v23  ;;  %v124_v28 = vmax.f32 %v3154_v5, %v3239_v24  ;;  %v123_v29 = vmax.f32 %v3153_v4, %v3238_v25 }
  0x7d   :  { %v3270_v37 = vpack.i.bf16 %v3393_v26, %v3395_v27  ;;  %v3255_v38 = vpack.i.bf16 %v124_v28, %v123_v29 }
  0x7f   :  { %3271 = vrot.lane.b32.xlu1 %v3270_v37, %s3331_s14  ;;  %3256 = vrot.lane.b32.xlu2 %v3255_v38, %s3331_s14 }
  0x80   :  { %v3252_v30 = vpop.permute.xlu1 %3251  ;;  %v3242_v31 = vpop.permute.xlu0 %3241 }
  0x81   :  { %v3254_v32 = vunpack.i.h.bf16 %v3252_v30  ;;  %v3253_v33 = vunpack.i.l.bf16 %v3252_v30  ;;  %v3244_v34 = vunpack.i.h.bf16 %v3242_v31  ;;  %v3243_v35 = vunpack.i.l.bf16 %v3242_v31 }
  0x83   :  { %v3404_v39 = vmax.f32 %v3166_v11, %v3254_v32  ;;  %v3406_v40 = vmax.f32 %v3165_v10, %v3253_v33  ;;  %v126_v41 = vmax.f32 %v3158_v13, %v3244_v34  ;;  %v125_v42 = vmax.f32 %v3157_v12, %v3243_v35 }
  0x85   :  { %v3280_v47 = vpack.i.bf16 %v3404_v39, %v3406_v40  ;;  %v3260_v48 = vpack.i.bf16 %v126_v41, %v125_v42 }
  0x87   :  { %3281 = vrot.lane.b32.xlu0 %v3280_v47, %s3331_s14  ;;  %3286 = vrot.lane.b32.xlu1 %v3285_v45, %s3330_s9 }
  0x88   :  { %v3267_v46 = vpop.permute.xlu0 %3266  ;;  %3261 = vrot.lane.b32.xlu2 %v3260_v48, %s3331_s14 }
  0x89   :  { %v3269_v50 = vunpack.i.h.bf16 %v3267_v46  ;;  %v3268_v51 = vunpack.i.l.bf16 %v3267_v46 }
  0x8b   :  { %v3424_v54 = vmax.f32 %v3170_v18, %v3269_v50  ;;  %v3426_v55 = vmax.f32 %v3169_v17, %v3268_v51 }
  0x8d   :  { %v3290_v57 = vpack.i.bf16 %v3424_v54, %v3426_v55 }
  0x90   :  { %3276 = vrot.lane.b32.xlu2 %v3275_v56, %s3330_s9 }
  0x98   :  { %3291 = vrot.lane.b32.xlu2 %v3290_v57, %s3331_s14 }
  0xa0   :  { %103 = vrot.lane.b32.xlu2 %v3181_v59, %s3330_s9 }
  0xd9   :  { %v3257_v0 = vpop.permute.xlu2 %3256 }
  0xda   :  { %v3259_v1 = vunpack.i.h.bf16 %v3257_v0  ;;  %v3258_v2 = vunpack.i.l.bf16 %v3257_v0 }
  0xdc   :  { %v236_v3 = vmax.f32 %v124_v28, %v3259_v1  ;;  %v235_v4 = vmax.f32 %v123_v29, %v3258_v2 }
  0xde   :  { %v252_v5 = vpack.c.bf16 %v236_v3, %v236_v3  ;;  %v251_v6 = vpack.c.bf16 %v235_v4, %v235_v4 }
  0xe0   :  { %269 = vst.msk [vmem:[#allocation2 + $0x4] sm:$0xf] %vm267_vm1, %v252_v5 }
  0xe1   :  { %268 = vst.msk [vmem:[#allocation2] sm:$0xf] %vm267_vm1, %v251_v6 }
  0xe2   :  { %v3262_v7 = vpop.permute.xlu2 %3261 }
  0xe3   :  { %v3264_v8 = vunpack.i.h.bf16 %v3262_v7  ;;  %v3263_v9 = vunpack.i.l.bf16 %v3262_v7 }
  0xe5   :  { %v238_v10 = vmax.f32 %v126_v41, %v3264_v8  ;;  %v237_v11 = vmax.f32 %v125_v42, %v3263_v9 }
  0xe7   :  { %v254_v12 = vpack.c.bf16 %v238_v10, %v238_v10  ;;  %v253_v13 = vpack.c.bf16 %v237_v11, %v237_v11 }
  0xe8   :  { %v3184_v14 = vld [vmem:[#allocation2] sm:$0xff]  }
  0xe9   :  { %271 = vst.msk [vmem:[#allocation2 + $0xc] sm:$0xf] %vm267_vm1, %v254_v12  ;;  %2911 = vmatmul.msk.bf16.vlgmr.msra.gmra.mxu1 %vm393_vm2, %v3184_v14  ;;  %v341_v22 = vshll.u32 %v3184_v14, 16  ;;  %v339_v35 = vshrl.u32 %v3184_v14, 16 }
  0xea   :  { %270 = vst.msk [vmem:[#allocation2 + $0x8] sm:$0xf] %vm267_vm1, %v253_v13  ;;  %v3277_v15 = vpop.permute.xlu2 %3276 }
  0xeb   :  { %v3279_v17 = vunpack.i.h.bf16 %v3277_v15  ;;  %v3278_v18 = vunpack.i.l.bf16 %v3277_v15  ;;  %v343_v28 = vrot.slane %v341_v22, 1  ;;  %v3182_v15 = vunpack.c.h.bf16 %v3435_v58 }
  0xed   :  { %v3458_v20 = vmax.f32 %v3174_v53, %v3279_v17  ;;  %v3460_v21 = vmax.f32 %v3173_v52, %v3278_v18  ;;  %v344_v46 = vor.u32 %v343_v28, %v339_v35  ;;  %v2962_v18 = vld [vmem:[%s4614_s1 + $0xa] sm:$0x3] }
  0xee   :  { %v941_v19 = vsel %vm415_vm0, %v2962_v18, 0 }
  0xef   :  { %v3295_v33 = vpack.i.bf16 %v3458_v20, %v3460_v21  ;;  %950 = vmatpush.bf16.msrb.mxu1 %v941_v19 }
  0xf1   :  { %v3462_v23 = vld [vmem:[#allocation2 + $0x8] sm:$0xff]  ;;  %v3272_v29 = vpop.permute.xlu1 %3271  ;;  %3296 = vrot.lane.b32.xlu0 %v3295_v33, %s3331_s14 }
  0xf2   :  { %v3464_v24 = vld [vmem:[#allocation2 + $0x4] sm:$0xff]   ;;  %v3292_v30 = vpop.permute.xlu2 %3291  ;;  %v3274_v31 = vunpack.i.h.bf16 %v3272_v29  ;;  %v3273_v32 = vunpack.i.l.bf16 %v3272_v29  ;;  %v346_v38 = vshll.u32 %v3462_v23, 16  ;;  %v350_v36 = vshrl.u32 %v3462_v23, 16 }
  0xf3   :  { %v3466_v25 = vld [vmem:[#allocation2 + $0x4] sm:$0xf0]  ;;  %v3294_v34 = vunpack.i.h.bf16 %v3292_v30  ;;  %v3293_v37 = vunpack.i.l.bf16 %v3292_v30  ;;  %v536_v6 = vrot.slane %v3462_v23, 1 }
  0xf4   :  { %v240_v41 = vmax.f32 %v3393_v26, %v3274_v31  ;;  %v239_v42 = vmax.f32 %v3395_v27, %v3273_v32  ;;  %v348_v48 = vrot.slane %v346_v38, 1 }
  0xf5   :  { %v244_v45 = vmax.f32 %v3424_v54, %v3294_v34  ;;  %v243_v47 = vmax.f32 %v3426_v55, %v3293_v37 }
  0xf6   :  { %v256_v49 = vpack.c.bf16 %v240_v41, %v240_v41  ;;  %v255_v50 = vpack.c.bf16 %v239_v42, %v239_v42  ;;  %v349_v53 = vsel %vm337_vm3, %v344_v46, %v348_v48  ;;  %v352_v7 = vor.u32 %v350_v36, %v348_v48  ;;  %v3315_v41 = vld [vmem:[#allocation2 + $0x4] sm:$0xe] }
  0xf7   :  { %v260_v51 = vpack.c.bf16 %v244_v45, %v244_v45  ;;  %v259_v52 = vpack.c.bf16 %v243_v47, %v243_v47  ;;  %2904 = vmatmul.msk.bf16.vlgmr.msra.gmra.mxu0 %vm393_vm2, %v349_v53  ;;  %v3316_v45 = vor.u32 %v3315_v41, %v3466_v25 }
  0xf8   :  { %273 = vst.msk [vmem:[#allocation2 + $0x14] sm:$0xf] %vm267_vm1, %v256_v49 }
  0xf9   :  { %v3282_v26 = vpop.permute.xlu0 %3281  ;;  %272 = vst.msk [vmem:[#allocation2 + $0x10] sm:$0xf] %vm267_vm1, %v255_v50  ;;  %2912 = vmatmul.msk.bf16.gmra.mxu1 %vm393_vm2, %v3462_v23  ;;  %v3287_v27 = vpop.permute.xlu1 %3286  ;;  %v906_v47 = vrot.slane %v3316_v45, 1  ;;  %v771_v23 = vshll.u32 %v3464_v24, 16 }
  0xfa   :  { %v3284_v54 = vunpack.i.h.bf16 %v3282_v26  ;;  %v3283_v55 = vunpack.i.l.bf16 %v3282_v26  ;;  %v104_v56 = vpop.permute.xlu2 %103  ;;  %277 = vst.msk [vmem:[#allocation2 + $0x24] sm:$0xf] %vm267_vm1, %v260_v51  ;;  %v3289_v57 = vunpack.i.h.bf16 %v3287_v27  ;;  %v3288_v60 = vunpack.i.l.bf16 %v3287_v27 }
  0xfb   :  { %v137_v61 = vmax.f32 %v3181_v59, %v104_v56  ;;  %276 = vst.msk [vmem:[#allocation2 + $0x20] sm:$0xf] %vm267_vm1, %v259_v52 }
  0xfc   :  { %v242_v62 = vmax.f32 %v3404_v39, %v3284_v54  ;;  %v241_v63 = vmax.f32 %v3406_v40, %v3283_v55  ;;  %v3490_v0 = vmax.f32 %v3178_v44, %v3289_v57  ;;  %v3494_v1 = vmax.f32 %v3177_v43, %v3288_v60 }
  0xfd   :  { %v153_v2 = vpack.c.bf16 %v137_v61, %v137_v61 }
  0xfe   :  { %v258_v3 = vpack.c.bf16 %v242_v62, %v242_v62  ;;  %v257_v4 = vpack.c.bf16 %v241_v63, %v241_v63  ;;  %v3300_v40 = vpack.i.bf16 %v3490_v0, %v3494_v1 }
  0xff   :  { %v3496_v5 = vunpack.c.l.bf16 %v153_v2 }
 0x100   :  { %275 = vst.msk [vmem:[#allocation2 + $0x1c] sm:$0xf] %vm267_vm1, %v258_v3  ;;  %v3125_v39 = vld [vmem:[#allocation2 + $0x10] sm:$0xff]  ;;  %3301 = vrot.lane.b32.xlu1 %v3300_v40, %s3331_s14  ;;  %v2926_v3 = vld [vmem:[%s4614_s1 + $0x6] sm:$0x3] }
 0x101   :  { %274 = vst.msk [vmem:[#allocation2 + $0x18] sm:$0xf] %vm267_vm1, %v257_v4  ;;  %215 = vrot.lane.b32.xlu0 %v3496_v5, %s3331_s14  ;;  %v354_v43 = vshll.u32 %v3125_v39, 16  ;;  %v538_v44 = vrot.slane %v3125_v39, 1  ;;  %v358_v29 = vshrl.u32 %v3125_v39, 16  ;;  %v3541_v42 = vld [vmem:[#allocation2 + $0xc] sm:$0xff] }
 0x102   :  { %v3505_v59 = vld [vmem:[#allocation2 + $0x20] sm:$0xff]  ;;  %v907_v46 = vrot.slane %v3541_v42, 1 }
 0x103   :  { %v356_v8 = vrot.slane %v354_v43, 1  ;;  %v370_v9 = vshll.u32 %v3505_v59, 16  ;;  %v374_v10 = vshrl.u32 %v3505_v59, 16  ;;  %v3514_v11 = vsel %vm534_vm4, %v536_v6, %v538_v44 }
 0x104   :  { %v542_v33 = vrot.slane %v3505_v59, 1  ;;  %v908_v48 = vsel %vm534_vm4, %v906_v47, %v907_v46 }
 0x105   :  { %v357_v12 = vsel %vm337_vm3, %v352_v7, %v356_v8  ;;  %v372_v13 = vrot.slane %v370_v9, 1  ;;  %v360_v31 = vor.u32 %v358_v29, %v356_v8 }
 0x107   :  { %2905 = vmatmul.msk.bf16.gmra.mxu0 %vm393_vm2, %v357_v12  ;;  %v3519_v16 = vor.u32 %v374_v10, %v372_v13  ;;  %v3552_v52 = vld [vmem:[#allocation2 + $0x1c] sm:$0xff] }
 0x108   :  { %v3126_v14 = vld [vmem:[#allocation2 + $0x18] sm:$0xff]  ;;  %105 = vrot.lane.b32.xlu1 %v3182_v15, %s3330_s9  ;;  %v911_v53 = vrot.slane %v3552_v52, 1 }
 0x109   :  { %2913 = vmatmul.msk.bf16.gmra.mxu1 %vm393_vm2, %v3125_v39  ;;  %v540_v17 = vrot.slane %v3126_v14, 1  ;;  %v362_v28 = vshll.u32 %v3126_v14, 16  ;;  %v366_v35 = vshrl.u32 %v3126_v14, 16  ;;  %v3547_v49 = vld [vmem:[#allocation2 + $0x14] sm:$0xff] }
 0x10a   :  { %v909_v50 = vrot.slane %v3547_v49, 1 }
 0x10b   :  { %v541_v22 = vsel %vm534_vm4, %v538_v44, %v540_v17  ;;  %v364_v30 = vrot.slane %v362_v28, 1  ;;  %v543_v34 = vsel %vm534_vm4, %v540_v17, %v542_v33 }
 0x10c   :  { %2921 = vmatmul.msk.bf16.vlgmr.msra.gmra.mxu2 %vm393_vm2, %v541_v22  ;;  %v910_v51 = vsel %vm534_vm4, %v907_v46, %v909_v50  ;;  %v912_v25 = vsel %vm534_vm4, %v909_v50, %v911_v53  ;;  %v2970_v46 = vld [vmem:[%s4614_s1 + $0xc] sm:$0x3] }
 0x10d   :  { %v365_v32 = vsel %vm337_vm3, %v360_v31, %v364_v30  ;;  %v368_v37 = vor.u32 %v366_v35, %v364_v30 }
 0x10f   :  { %v373_v38 = vsel %vm337_vm3, %v368_v37, %v372_v13 }
 0x117   :  { %2906 = vmatmul.msk.bf16.gmra.mxu0 %vm393_vm2, %v365_v32 }
 0x119   :  { %2914 = vmatmul.msk.bf16.gmra.mxu1 %vm393_vm2, %v3126_v14 }
 0x11c   :  { %2922 = vmatmul.msk.bf16.gmra.mxu2 %vm393_vm2, %v543_v34 }
 0x127   :  { %2907 = vmatmul.msk.bf16.gmra.mxu0 %vm393_vm2, %v373_v38 }
 0x129   :  { %2915 = vmatmul.msk.bf16.gmra.mxu1 %vm393_vm2, %v3505_v59 }
 0x139   :  { %2963 = vmatmul.msk.bf16.vlgmr.msrb.gmra.mxu1 %vm393_vm2, %v908_v48 }
 0x149   :  { %2964 = vmatmul.msk.bf16.gmra.mxu1 %vm393_vm2, %v910_v51  ;;  %v1074_v51 = vsel %vm415_vm0, %v2970_v46, 0 }
 0x14a   :  { %1083 = vmatpush.bf16.msrb.mxu2 %v1074_v51  ;;  %v786_v51 = vshrl.u32 %v3547_v49, 16 }
 0x159   :  { %2965 = vmatmul.msk.bf16.gmra.mxu1 %vm393_vm2, %v912_v25 }
 0x163   :  { %v3297_v26 = vpop.permute.xlu0 %3296 }
 0x164   :  { %v3299_v27 = vunpack.i.h.bf16 %v3297_v26  ;;  %v3298_v54 = vunpack.i.l.bf16 %v3297_v26 }
 0x166   :  { %v493_v55 = vpop.f32.mrf.mxu1  ;;  %v246_v56 = vmax.f32 %v3458_v20, %v3299_v27  ;;  %v245_v57 = vmax.f32 %v3460_v21, %v3298_v54  ;;  %v703_v21 = vsel %vm415_vm0, %v2926_v3, 0 }
 0x167   :  { %712 = vmatpush.bf16.msrb.mxu3 %v703_v21 }
 0x168   :  { %v262_v60 = vpack.c.bf16 %v246_v56, %v246_v56  ;;  %v261_v61 = vpack.c.bf16 %v245_v57, %v245_v57 }
 0x16a   :  { %279 = vst.msk [vmem:[#allocation2 + $0x2c] sm:$0xf] %vm267_vm1, %v262_v60 }
 0x16b   :  { %278 = vst.msk [vmem:[#allocation2 + $0x28] sm:$0xf] %vm267_vm1, %v261_v61 }
 0x16e   :  { %v3561_v63 = vpop.f32.mrf.mxu1 }
 0x172   :  { %v3128_v39 = vld [vmem:[#allocation2 + $0x28] sm:$0xff]  ;;  %v3302_v43 = vpop.permute.xlu1 %3301 }
 0x173   :  { %v216_v62 = vpop.permute.xlu0 %215  ;;  %v3567_v40 = vld [vmem:[#allocation2 + $0x24] sm:$0xff]  ;;  %v3304_v44 = vunpack.i.h.bf16 %v3302_v43  ;;  %v3303_v59 = vunpack.i.l.bf16 %v3302_v43  ;;  %2916 = vmatmul.msk.bf16.vlgmr.msra.gmra.mxu3 %vm393_vm2, %v3128_v39  ;;  %v378_v8 = vshll.u32 %v3128_v39, 16  ;;  %v382_v35 = vshrl.u32 %v3128_v39, 16 }
 0x174   :  { %v249_v2 = vmax.f32 %v3496_v5, %v216_v62  ;;  %v428_v4 = vpop.f32.mrf.mxu0  ;;  %v544_v5 = vrot.slane %v3128_v39, 1  ;;  %v913_v7 = vrot.slane %v3567_v40, 1 }
 0x175   :  { %v3570_v36 = vadd.f32 %v493_v55, %v428_v4  ;;  %v248_v9 = vmax.f32 %v3490_v0, %v3304_v44  ;;  %v247_v10 = vmax.f32 %v3494_v1, %v3303_v59  ;;  %v380_v14 = vrot.slane %v378_v8, 1  ;;  %v2954_v55 = vld [vmem:[%s4614_s1 + $0x8] sm:$0x3]  ;;  %v2998_v59 = vld [vmem:[%s4614_s1 + $0xe] sm:$0x3] }
 0x176   :  { %v265_v20 = vpack.c.bf16 %v249_v2, %v249_v2  ;;  %v545_v12 = vsel %vm534_vm4, %v542_v33, %v544_v5  ;;  %v914_v13 = vsel %vm534_vm4, %v911_v53, %v913_v7  ;;  %v498_v22 = vpop.f32.mrf.mxu1  ;;  %v840_v56 = vsel %vm415_vm0, %v2954_v55, 0  ;;  %v3216_v8 = vld [vmem:[#allocation2] sm:$0xe] }
 0x177   :  { %2923 = vmatmul.msk.bf16.gmra.mxu2 %vm393_vm2, %v545_v12  ;;  %2966 = vmatmul.msk.bf16.gmra.mxu1 %vm393_vm2, %v914_v13  ;;  %v264_v17 = vpack.c.bf16 %v248_v9, %v248_v9  ;;  %v263_v18 = vpack.c.bf16 %v247_v10, %v247_v10  ;;  %v381_v19 = vsel %vm337_vm3, %v3519_v16, %v380_v14 }
 0x178   :  { %282 = vst.msk [vmem:[#allocation2 + $0x38] sm:$0xf] %vm267_vm1, %v265_v20  ;;  %2908 = vmatmul.msk.bf16.gmra.mxu0 %vm393_vm2, %v381_v19  ;;  %v384_v48 = vor.u32 %v382_v35, %v380_v14 }
 0x179   :  { %281 = vst.msk [vmem:[#allocation2 + $0x34] sm:$0xf] %vm267_vm1, %v264_v17  ;;  %849 = vmatpush.bf16.msra.mxu0 %v840_v56 }
 0x17a   :  { %280 = vst.msk [vmem:[#allocation2 + $0x30] sm:$0xf] %vm267_vm1, %v263_v18  ;;  %v106_v1 = vpop.permute.xlu1 %105  ;;  %v3645_v18 = vld [vmem:[#allocation2 + $0x8] sm:$0xff]  }
 0x17b   :  { %v138_v28 = vmax.f32 %v3182_v15, %v106_v1  ;;  %v3006_v1 = vld [vmem:[%s4614_s1 + $0x10] sm:$0x3] }
 0x17c   :  { %v3584_v0 = vpop.f32.mrf.mxu0 }
 0x17d   :  { %v154_v29 = vpack.c.bf16 %v138_v28, %v138_v28  ;;  %v1312_v28 = vsel %vm415_vm0, %v3006_v1, 0 }
 0x17e   :  { %v3598_v58 = vpop.f32.mrf.mxu1 }
 0x17f   :  { %v3590_v30 = vunpack.c.l.bf16 %v154_v29  ;;  %v3660_v29 = vld [vmem:[#allocation2 + $0x10] sm:$0xff] }
 0x180   :  { %v3229_v31 = vld [vmem:[#allocation2 + $0x30] sm:$0x70] }
 0x181   :  { %217 = vrot.lane.b32.xlu2 %v3590_v30, %s3331_s14  ;;  %v3213_v16 = vld [vmem:[#allocation2 + $0x30] sm:$0xf]   ;;  %v3611_v26 = vld [vmem:[#allocation2 + $0x34] sm:$0xff]  }
 0x182   :  { %v3210_v33 = vld [vmem:[#allocation2 + $0x30] sm:$0xff]   ;;  %v3214_v38 = vor.u32 %v3229_v31, %v3213_v16  ;;  %v917_v62 = vrot.slane %v3611_v26, 1  ;;  %v773_v31 = vrot.slane %v771_v23, 1  ;;  %v3671_v16 = vld [vmem:[#allocation2 + $0x18] sm:$0xff]  ;;  %v1140_v23 = vshrl.u32 %v3645_v18, 16 }
 0x183   :  { %v3594_v34 = vld [vmem:[#allocation2 + $0x2c] sm:$0xff]  ;;  %v546_v41 = vrot.slane %v3210_v33, 1  ;;  %v386_v45 = vshll.u32 %v3210_v33, 16  ;;  %v3613_v27 = vld [vmem:[#allocation2 + $0x34] sm:$0xf]   ;;  %v390_v39 = vshrl.u32 %v3210_v33, 16 }
 0x184   :  { %v433_v32 = vpop.f32.mrf.mxu0  ;;  %v915_v15 = vrot.slane %v3594_v34, 1  ;;  %2917 = vmatmul.msk.bf16.gmra.mxu3 %vm393_vm2, %v3214_v38 }
 0x185   :  { %v3596_v37 = vadd.f32 %v498_v22, %v433_v32  ;;  %v547_v47 = vsel %vm534_vm4, %v544_v5, %v546_v41  ;;  %v388_v50 = vrot.slane %v386_v45, 1  ;;  %v1211_v5 = vsel %vm415_vm0, %v2998_v59, 0 }
 0x186   :  { %v916_v53 = vsel %vm534_vm4, %v913_v7, %v915_v15  ;;  %v503_v57 = vpop.f32.mrf.mxu1  ;;  %v918_v4 = vsel %vm534_vm4, %v915_v15, %v917_v62  ;;  %1220 = vmatpush.bf16.msra.mxu3 %v1211_v5  ;;  %v3215_v7 = vld [vmem:[#allocation2] sm:$0xf0]  ;;  %v769_v32 = vshrl.u32 %v3464_v24, 16 }
 0x187   :  { %2924 = vmatmul.msk.bf16.gmra.mxu2 %vm393_vm2, %v547_v47  ;;  %2967 = vmatmul.msk.bf16.gmra.mxu1 %vm393_vm2, %v916_v53  ;;  %v389_v25 = vsel %vm337_vm3, %v384_v48, %v388_v50  ;;  %v392_v21 = vor.u32 %v390_v39, %v388_v50  ;;  %v3217_v13 = vor.u32 %v3216_v8, %v3215_v7  ;;  %v789_v53 = vshll.u32 %v3552_v52, 16  ;;  %v3710_v39 = vld [vmem:[#allocation2 + $0x30] sm:$0xff] }
 0x188   :  { %2909 = vmatmul.msk.bf16.gmra.mxu0 %vm393_vm2, %v389_v25  ;;  %v774_v35 = vor.u32 %v773_v31, %v769_v32  ;;  %v803_v31 = vshll.u32 %v3594_v34, 16 }
 0x189   :  { %v535_v19 = vrot.slane %v3217_v13, 1  ;;  %v791_v55 = vrot.slane %v789_v53, 1  ;;  %v1142_v13 = vshll.u32 %v3645_v18, 16 }
 0x18b   :  { %v537_v22 = vsel %vm534_vm4, %v535_v19, %v536_v6  ;;  %v775_v6 = vshll.u32 %v3541_v42, 16  ;;  %v1144_v19 = vrot.slane %v1142_v13, 1 }
 0x18c   :  { %v3615_v54 = vpop.f32.mrf.mxu0 }
 0x18d   :  { %v777_v33 = vrot.slane %v775_v6, 1  ;;  %v1145_v32 = vor.u32 %v1144_v19, %v1140_v23 }
 0x18e   :  { %v3630_v20 = vpop.f32.mrf.mxu1 }
 0x18f   :  { %v591_v60 = vpop.f32.mrf.mxu2  ;;  %v778_v38 = vsel %vm337_vm3, %v774_v35, %v777_v33 }
 0x194   :  { %v438_v61 = vpop.f32.mrf.mxu0  ;;  %2947 = vmatmul.msk.bf16.vlgmr.msrb.gmra.mxu3 %vm393_vm2, %v3464_v24  ;;  %v3680_v24 = vld [vmem:[#allocation2 + $0x20] sm:$0xff] }
 0x195   :  { %v504_v2 = vadd.f32 %v503_v57, %v438_v61 }
 0x196   :  { %v508_v9 = vpop.f32.mrf.mxu1 }
 0x197   :  { %v3625_v3 = vadd.f32 %v591_v60, %v504_v2  ;;  %2925 = vmatmul.msk.bf16.gmra.mxu2 %vm393_vm2, %v546_v41  ;;  %2968 = vmatmul.msk.bf16.gmra.mxu1 %vm393_vm2, %v918_v4  ;;  %v3632_v43 = vpop.f32.mrf.mxu2  ;;  %v779_v41 = vshrl.u32 %v3541_v42, 16 }
 0x198   :  { %2910 = vmatmul.msk.bf16.gmra.mxu0 %vm393_vm2, %v392_v21  ;;  %v793_v21 = vshrl.u32 %v3552_v52, 16 }
 0x199   :  { %v781_v15 = vor.u32 %v779_v41, %v777_v33  ;;  %v805_v41 = vrot.slane %v803_v31, 1  ;;  %v815_v31 = vshrl.u32 %v3611_v26, 16 }
 0x19a   :  { %v795_v8 = vor.u32 %v793_v21, %v791_v55 }
 0x19c   :  { %v3634_v44 = vpop.f32.mrf.mxu0 }
 0x19e   :  { %v3701_v60 = vpop.f32.mrf.mxu1 }
 0x19f   :  { %v596_v14 = vpop.f32.mrf.mxu2 }
 0x1a4   :  { %v443_v10 = vpop.f32.mrf.mxu0  ;;  %2948 = vmatmul.msk.bf16.gmra.mxu3 %vm393_vm2, %v3541_v42  ;;  %v3693_v42 = vld [vmem:[#allocation2 + $0x28] sm:$0xff] }
 0x1a5   :  { %v509_v12 = vadd.f32 %v508_v9, %v443_v10 }
 0x1a6   :  { %v513_v9 = vpop.f32.mrf.mxu1 }
 0x1a7   :  { %v3643_v17 = vadd.f32 %v596_v14, %v509_v12  ;;  %2969 = vmatmul.msk.bf16.gmra.mxu1 %vm393_vm2, %v917_v62  ;;  %2991 = vmatmul.msk.bf16.vlgmr.msrb.gmra.mxu2 %vm393_vm2, %v3645_v18  ;;  %v796_v62 = vshll.u32 %v3567_v40, 16  ;;  %v3706_v2 = vpop.f32.mrf.mxu2 }
 0x1a8   :  { %2919 = vmatmul.msk.bf16.vlgmr.msrb.gmra.mxu0 %vm393_vm2, %v537_v22 }
 0x1a9   :  { %1321 = vmatpush.bf16.msrb.mxu0 %v1312_v28  ;;  %v798_v59 = vrot.slane %v796_v62, 1 }
 0x1ab   :  { %v799_v12 = vsel %vm337_vm3, %v795_v8, %v798_v59 }
 0x1ac   :  { %v3703_v61 = vpop.f32.mrf.mxu0 }
 0x1b4   :  { %2949 = vmatmul.msk.bf16.gmra.mxu3 %vm393_vm2, %v3547_v49 }
 0x1b7   :  { %2992 = vmatmul.msk.bf16.gmra.mxu2 %vm393_vm2, %v3660_v29 }
 0x1b8   :  { %2920 = vmatmul.msk.bf16.gmra.mxu0 %vm393_vm2, %v3514_v11  ;;  %v782_v11 = vshll.u32 %v3547_v49, 16  ;;  %v3328_v49 = vld [vmem:[#allocation2 + $0x34] sm:$0x70] }
 0x1b9   :  { %v3320_v4 = vor.u32 %v3328_v49, %v3613_v27 }
 0x1ba   :  { %v784_v45 = vrot.slane %v782_v11, 1  ;;  %v800_v11 = vshrl.u32 %v3567_v40, 16 }
 0x1bc   :  { %v785_v46 = vsel %vm337_vm3, %v781_v15, %v784_v45  ;;  %v788_v25 = vor.u32 %v786_v51, %v784_v45  ;;  %v802_v15 = vor.u32 %v800_v11, %v798_v59  ;;  %v1153_v51 = vshll.u32 %v3671_v16, 16 }
 0x1be   :  { %v792_v57 = vsel %vm337_vm3, %v788_v25, %v791_v55  ;;  %v1150_v55 = vshrl.u32 %v3660_v29, 16 }
 0x1c4   :  { %2950 = vmatmul.msk.bf16.gmra.mxu3 %vm393_vm2, %v3552_v52  ;;  %v1146_v52 = vshll.u32 %v3660_v29, 16 }
 0x1c6   :  { %v1148_v6 = vrot.slane %v1146_v52, 1 }
 0x1c7   :  { %2993 = vmatmul.msk.bf16.gmra.mxu2 %vm393_vm2, %v3671_v16 }
 0x1c8   :  { %2955 = vmatmul.msk.bf16.vlgmr.msra.gmra.mxu0 %vm393_vm2, %v778_v38  ;;  %v1149_v35 = vsel %vm337_vm3, %v1145_v32, %v1148_v6  ;;  %v1152_v62 = vor.u32 %v1150_v55, %v1148_v6  ;;  %v3220_v55 = vld [vmem:[#allocation2 + $0x8] sm:$0xe] }
 0x1d4   :  { %2951 = vmatmul.msk.bf16.gmra.mxu3 %vm393_vm2, %v3567_v40 }
 0x1d7   :  { %2994 = vmatmul.msk.bf16.gmra.mxu2 %vm393_vm2, %v3680_v24 }
 0x1d8   :  { %2956 = vmatmul.msk.bf16.gmra.mxu0 %vm393_vm2, %v785_v46 }
 0x1db   :  { %v218_v47 = vpop.permute.xlu2 %217 }
 0x1dc   :  { %v250_v48 = vmax.f32 %v3590_v30, %v218_v47  ;;  %v3323_v30 = vld [vmem:[#allocation2 + $0x38] sm:$0xf]   ;;  %v806_v47 = vsel %vm337_vm3, %v802_v15, %v805_v41  ;;  %v1373_v15 = vld [vmem:[%s4615_s5 + $0x8] sm:$0xff] }
 0x1de   :  { %v266_v50 = vpack.c.bf16 %v250_v48, %v250_v48 }
 0x1e0   :  { %283 = vst.msk [vmem:[#allocation2 + $0x3c] sm:$0xf] %vm267_vm1, %v266_v50 }
 0x1e4   :  { %2952 = vmatmul.msk.bf16.gmra.mxu3 %vm393_vm2, %v3594_v34 }
 0x1e7   :  { %2995 = vmatmul.msk.bf16.gmra.mxu2 %vm393_vm2, %v3693_v42  ;;  %v3697_v56 = vld [vmem:[#allocation2 + $0x38] sm:$0xff]  }
 0x1e8   :  { %2957 = vmatmul.msk.bf16.gmra.mxu0 %vm393_vm2, %v792_v57  ;;  %v3329_v22 = vld [vmem:[#allocation2 + $0x38] sm:$0x70]  ;;  %v811_v57 = vshll.u32 %v3611_v26, 16  ;;  %v1167_v26 = vshll.u32 %v3693_v42, 16 }
 0x1e9   :  { %v3324_v38 = vor.u32 %v3329_v22, %v3323_v30  ;;  %v1155_v30 = vrot.slane %v1153_v51, 1 }
 0x1eb   :  { %v1156_v21 = vsel %vm337_vm3, %v1152_v62, %v1155_v30 }
 0x1f4   :  { %2953 = vmatmul.msk.bf16.gmra.mxu3 %vm393_vm2, %v3320_v4  ;;  %v807_v4 = vshrl.u32 %v3594_v34, 16  ;;  %v1160_v34 = vshll.u32 %v3680_v24, 16 }
 0x1f5   :  { %v448_v5 = vpop.f32.mrf.mxu0 }
 0x1f6   :  { %v518_v7 = vpop.f32.mrf.mxu3  ;;  %v514_v10 = vadd.f32 %v513_v9, %v448_v5  ;;  %v809_v59 = vor.u32 %v807_v4, %v805_v41  ;;  %v813_v5 = vrot.slane %v811_v57, 1  ;;  %v1162_v23 = vrot.slane %v1160_v34, 1 }
 0x1f7   :  { %2996 = vmatmul.msk.bf16.gmra.mxu2 %vm393_vm2, %v3710_v39 }
 0x1f8   :  { %2958 = vmatmul.msk.bf16.gmra.mxu0 %vm393_vm2, %v799_v12  ;;  %v817_v11 = vor.u32 %v815_v31, %v813_v5 }
 0x1fa   :  { %v601_v27 = vpop.f32.mrf.mxu2 }
 0x1fb   :  { %v3718_v14 = vadd.f32 %v601_v27, %v514_v10  ;;  %v814_v10 = vsel %vm337_vm3, %v809_v59, %v813_v5  ;;  %v1157_v27 = vshrl.u32 %v3671_v16, 16 }
 0x1fd   :  { %v3721_v1 = vpop.f32.mrf.mxu0 }
 0x1fe   :  { %v520_v28 = vpop.f32.mrf.mxu3 }
 0x202   :  { %v3725_v33 = vpop.f32.mrf.mxu2 }
 0x204   :  { %2999 = vmatmul.msk.bf16.vlgmr.msra.gmra.mxu3 %vm393_vm2, %v1149_v35 }
 0x205   :  { %v453_v45 = vpop.f32.mrf.mxu0 }
 0x206   :  { %v519_v46 = vadd.f32 %v518_v7, %v453_v45  ;;  %v1372_v45 = vld [vmem:[%s4615_s5] sm:$0xff] }
 0x207   :  { %2997 = vmatmul.msk.bf16.gmra.mxu2 %vm393_vm2, %v3324_v38  ;;  %v523_v18 = vpop.f32.mrf.mxu3 }
 0x208   :  { %2959 = vmatmul.msk.bf16.gmra.mxu0 %vm393_vm2, %v806_v47 }
 0x20a   :  { %v606_v48 = vpop.f32.mrf.mxu2 }
 0x20b   :  { %v3733_v50 = vadd.f32 %v606_v48, %v519_v46  ;;  %v3332_v46 = vmov 0  }
 0x20c   :  { %3305 = vset.pattern.permute.xlu0 %v3332_v46  ;;  %3306 = vset.pattern.permute.xlu1 %v3332_v46 }
 0x20d   :  { %v455_v53 = vpop.f32.mrf.mxu0  ;;  %1404 = vperm.xlu0 %3305, %v1372_v45   ;;  %1409 = vperm.xlu1 %3306, %v1373_v15  }
 0x20e   :  { %v3736_v25 = vadd.f32 %v520_v28, %v455_v53  ;;  %v1159_v28 = vor.u32 %v1157_v27, %v1155_v30  ;;  %3307 = vset.pattern.permute.xlu2 %v3332_v46  ;;  %v1169_v53 = vrot.slane %v1167_v26, 1  ;;  %v1174_v27 = vshll.u32 %v3710_v39, 16 }
 0x20f   :  { %v525_v40 = vpop.f32.mrf.mxu3 }
 0x210   :  { %v1163_v6 = vsel %vm337_vm3, %v1159_v28, %v1162_v23  ;;  %v1171_v28 = vshrl.u32 %v3693_v42, 16 }
 0x212   :  { %v3740_v49 = vpop.f32.mrf.mxu2 }
 0x214   :  { %3000 = vmatmul.msk.bf16.gmra.mxu3 %vm393_vm2, %v1156_v21  ;;  %v1278_v21 = vrot.slane %v3660_v29, 1  ;;  %v1378_v29 = vld [vmem:[%s4615_s5 + $0x30] sm:$0xff] }
 0x215   :  { %v458_v7 = vpop.f32.mrf.mxu0 }
 0x216   :  { %v524_v8 = vadd.f32 %v523_v18, %v458_v7  ;;  %v1164_v18 = vshrl.u32 %v3680_v24, 16 }
 0x217   :  { %v714_v9 = vpop.f32.mrf.mxu3 }
 0x218   :  { %2960 = vmatmul.msk.bf16.gmra.mxu0 %vm393_vm2, %v814_v10  ;;  %v1166_v30 = vor.u32 %v1164_v18, %v1162_v23  ;;  %v1176_v23 = vrot.slane %v1174_v27, 1 }
 0x21a   :  { %v611_v12 = vpop.f32.mrf.mxu2  ;;  %v1170_v4 = vsel %vm337_vm3, %v1166_v30, %v1169_v53  ;;  %v1178_v30 = vshrl.u32 %v3710_v39, 16 }
 0x21b   :  { %v3747_v13 = vadd.f32 %v611_v12, %v524_v8  ;;  %v3780_v12 = vpop.f32.mrf.mxu1 }
 0x21d   :  { %v460_v52 = vpop.f32.mrf.mxu0 }
 0x21e   :  { %v3751_v19 = vadd.f32 %v525_v40, %v460_v52  ;;  %v3219_v40 = vld [vmem:[#allocation2 + $0x8] sm:$0xf0] }
 0x21f   :  { %v716_v22 = vpop.f32.mrf.mxu3  ;;  %v3221_v62 = vor.u32 %v3220_v55, %v3219_v40 }
 0x221   :  { %v1277_v59 = vrot.slane %v3221_v62, 1 }
 0x222   :  { %v3786_v34 = vpop.f32.mrf.mxu2 }
 0x224   :  { %3001 = vmatmul.msk.bf16.gmra.mxu3 %vm393_vm2, %v1163_v6  ;;  %v1173_v6 = vor.u32 %v1171_v28, %v1169_v53  ;;  %v1379_v28 = vld [vmem:[%s4615_s5 + $0x38] sm:$0xff] }
 0x225   :  { %v581_v32 = vpop.f32.mrf.mxu0 }
 0x226   :  { %v616_v35 = vadd.f32 %v581_v32, %v3570_v36  ;;  %v496_v36 = vadd.f32 %v3561_v63, %v3584_v0  ;;  %v1375_v63 = vld [vmem:[%s4615_s5 + $0x18] sm:$0xff]  ;;  %v1377_v32 = vld [vmem:[%s4615_s5 + $0x28] sm:$0xff] }
 0x227   :  { %v719_v38 = vpop.f32.mrf.mxu3  ;;  %1419 = vperm.xlu1 %3306, %v1375_v63   ;;  %1429 = vperm.xlu0 %3305, %v1377_v32   ;;  %v1376_v63 = vld [vmem:[%s4615_s5 + $0x20] sm:$0xff] }
 0x228   :  { %2961 = vmatmul.msk.bf16.gmra.mxu0 %vm393_vm2, %v817_v11  ;;  %v749_v41 = vadd.f32 %v714_v9, %v616_v35  ;;  %v1279_v9 = vsel %vm534_vm4, %v1277_v59, %v1278_v21  ;;  %v1177_v35 = vsel %vm337_vm3, %v1173_v6, %v1176_v23 }
 0x22a   :  { %v1085_v11 = vpop.f32.mrf.mxu2 }
 0x22d   :  { %v583_v47 = vpop.f32.mrf.mxu0 }
 0x22e   :  { %v617_v48 = vadd.f32 %v583_v47, %v496_v36  ;;  %v1380_v47 = vld [vmem:[%s4615_s5 + $0x40] sm:$0xff] }
 0x22f   :  { %v721_v51 = vpop.f32.mrf.mxu3  ;;  %1434 = vperm.xlu1 %3306, %v1378_v29   ;;  %1444 = vperm.xlu0 %3305, %v1380_v47   ;;  %v1385_v47 = vld [vmem:[%s4615_s5 + $0x68] sm:$0x3f] }
 0x230   :  { %v750_v57 = vadd.f32 %v716_v22, %v617_v48 }
 0x234   :  { %3002 = vmatmul.msk.bf16.gmra.mxu3 %vm393_vm2, %v1170_v4  ;;  %v3826_v4 = vpop.f32.mrf.mxu2 }
 0x235   :  { %v586_v0 = vpop.f32.mrf.mxu0 }
 0x236   :  { %v618_v5 = vadd.f32 %v586_v0, %v3596_v37  ;;  %v501_v37 = vadd.f32 %v3598_v58, %v3615_v54  ;;  %v1280_v58 = vrot.slane %v3671_v16, 1  ;;  %v1381_v54 = vld [vmem:[%s4615_s5 + $0x48] sm:$0xff]  ;;  %v1374_v16 = vld [vmem:[%s4615_s5 + $0x10] sm:$0xff]  ;;  %v1383_v0 = vld [vmem:[%s4615_s5 + $0x58] sm:$0xff] }
 0x237   :  { %v724_v7 = vpop.f32.mrf.mxu3  ;;  %1449 = vperm.xlu1 %3306, %v1381_v54   ;;  %1414 = vperm.xlu2 %3307, %v1374_v16   ;;  %v2631_v54 = vld [vmem:[%s4617_s6 + $0x18] sm:$0xff] }
 0x238   :  { %v3776_v8 = vadd.f32 %v724_v7, %v3625_v3  ;;  %3007 = vmatmul.msk.bf16.vlgmr.msrb.gmra.mxu0 %vm393_vm2, %v1279_v9  ;;  %v751_v10 = vadd.f32 %v719_v38, %v618_v5  ;;  %v952_v38 = vpop.f32.mrf.mxu1  ;;  %v1281_v36 = vsel %vm534_vm4, %v1278_v21, %v1280_v58  ;;  %v1180_v21 = vor.u32 %v1178_v30, %v1176_v23  ;;  %v2628_v23 = vld [vmem:[%s4617_s6] sm:$0xff] }
 0x239   :  { %1459 = vperm.xlu0 %3305, %v1383_v0   ;;  %v1282_v7 = vrot.slane %v3680_v24, 1  ;;  %v2632_v24 = vld [vmem:[%s4617_s6 + $0x20] sm:$0xff]  ;;  %v1286_v30 = vrot.slane %v3710_v39, 1 }
 0x23a   :  { %v2636_v39 = vld [vmem:[%s4617_s6 + $0x40] sm:$0xff] }
 0x23c   :  { %v1090_v6 = vpop.f32.mrf.mxu2 }
 0x23d   :  { %v588_v3 = vpop.f32.mrf.mxu0 }
 0x23e   :  { %v619_v52 = vadd.f32 %v588_v3, %v501_v37  ;;  %v1283_v3 = vsel %vm534_vm4, %v1280_v58, %v1282_v7  ;;  %v1382_v58 = vld [vmem:[%s4615_s5 + $0x50] sm:$0xff] }
 0x23f   :  { %v3790_v22 = vpop.f32.mrf.mxu3  ;;  %1424 = vperm.xlu2 %3307, %v1376_v63  }
 0x240   :  { %v752_v31 = vadd.f32 %v721_v51, %v619_v52  ;;  %v3819_v51 = vpop.f32.mrf.mxu1 }
 0x241   :  { %2656 = vperm.xlu0 %3305, %v2628_v23  }
 0x244   :  { %3003 = vmatmul.msk.bf16.gmra.mxu3 %vm393_vm2, %v1177_v35 }
 0x245   :  { %v851_v45 = vpop.f32.mrf.mxu0 }
 0x246   :  { %v886_v15 = vadd.f32 %v851_v45, %v749_v41  ;;  %v1182_v41 = vshll.u32 %v3697_v56, 16  ;;  %v1284_v45 = vrot.slane %v3693_v42, 1  ;;  %v2634_v42 = vld [vmem:[%s4617_s6 + $0x30] sm:$0xff] }
 0x247   :  { %v729_v46 = vpop.f32.mrf.mxu3  ;;  %1439 = vperm.xlu2 %3307, %v1379_v28  }
 0x248   :  { %v3803_v26 = vadd.f32 %v729_v46, %v3643_v17  ;;  %v987_v18 = vadd.f32 %v952_v38, %v886_v15  ;;  %3008 = vmatmul.msk.bf16.gmra.mxu0 %vm393_vm2, %v1281_v36  ;;  %v1384_v17 = vld [vmem:[%s4615_s5 + $0x60] sm:$0xff]  ;;  %v1184_v62 = vrot.slane %v1182_v41, 1  ;;  %v957_v27 = vpop.f32.mrf.mxu1  ;;  %v1186_v38 = vshrl.u32 %v3697_v56, 16  ;;  %v2630_v41 = vld [vmem:[%s4617_s6 + $0x10] sm:$0xff] }
 0x249   :  { %1464 = vperm.xlu1 %3306, %v1384_v17   ;;  %2671 = vperm.xlu0 %3305, %v2631_v54   ;;  %v1285_v16 = vsel %vm534_vm4, %v1282_v7, %v1284_v45  ;;  %v1092_v54 = vpop.f32.mrf.mxu2 }
 0x24a   :  { %v3817_v48 = vadd.f32 %v1085_v11, %v987_v18  ;;  %v1185_v59 = vsel %vm337_vm3, %v1180_v21, %v1184_v62  ;;  %v1188_v11 = vor.u32 %v1186_v38, %v1184_v62 }
 0x24d   :  { %v853_v53 = vpop.f32.mrf.mxu0 }
 0x24e   :  { %v3821_v40 = vadd.f32 %v853_v53, %v750_v57  ;;  %v2629_v57 = vld [vmem:[%s4617_s6 + $0x8] sm:$0xff] }
 0x24f   :  { %v3823_v55 = vpop.f32.mrf.mxu3  ;;  %1454 = vperm.xlu2 %3307, %v1382_v58   ;;  %v2637_v53 = vld [vmem:[%s4617_s6 + $0x48] sm:$0xff] }
 0x251   :  { %2661 = vperm.xlu1 %3306, %v2629_v57   ;;  %2686 = vperm.xlu0 %3305, %v2634_v42   ;;  %v1287_v57 = vsel %vm534_vm4, %v1284_v45, %v1286_v30  ;;  %v3932_v45 = vpop.f32.mrf.mxu2 }
 0x254   :  { %3004 = vmatmul.msk.bf16.gmra.mxu3 %vm393_vm2, %v1185_v59  ;;  %v2633_v59 = vld [vmem:[%s4617_s6 + $0x28] sm:$0xff] }
 0x255   :  { %v856_v5 = vpop.f32.mrf.mxu0 }
 0x256   :  { %v888_v9 = vadd.f32 %v856_v5, %v751_v10 }
 0x257   :  { %v734_v29 = vpop.f32.mrf.mxu3  ;;  %1469 = vperm.xlu2 %3307, %v1385_v47  }
 0x258   :  { %v757_v37 = vadd.f32 %v734_v29, %v3718_v14  ;;  %v989_v52 = vadd.f32 %v957_v27, %v888_v9  ;;  %3009 = vmatmul.msk.bf16.gmra.mxu0 %vm393_vm2, %v1283_v3 }
 0x259   :  { %2676 = vperm.xlu1 %3306, %v2632_v24   ;;  %2701 = vperm.xlu0 %3305, %v2637_v53   ;;  %v3938_v47 = vpop.f32.mrf.mxu2 }
 0x25a   :  { %v1122_v14 = vadd.f32 %v1090_v6, %v989_v52  ;;  %v2639_v52 = vld [vmem:[%s4617_s6 + $0x58] sm:$0xf] }
 0x25d   :  { %v858_v10 = vpop.f32.mrf.mxu0 }
 0x25e   :  { %v3852_v32 = vadd.f32 %v858_v10, %v752_v31  ;;  %v2635_v31 = vld [vmem:[%s4617_s6 + $0x38] sm:$0xff]  ;;  %v959_v10 = vpop.f32.mrf.mxu1 }
 0x25f   :  { %v3854_v35 = vpop.f32.mrf.mxu3  ;;  %2666 = vperm.xlu2 %3307, %v2630_v41  }
 0x261   :  { %2691 = vperm.xlu1 %3306, %v2635_v31  }
 0x264   :  { %3005 = vmatmul.msk.bf16.gmra.mxu3 %vm393_vm2, %v1188_v11 }
 0x265   :  { %v861_v15 = vpop.f32.mrf.mxu0 }
 0x266   :  { %v3869_v46 = vadd.f32 %v861_v15, %v3776_v8  ;;  %v2638_v8 = vld [vmem:[%s4617_s6 + $0x50] sm:$0xff]  ;;  %v962_v31 = vpop.f32.mrf.mxu1 }
 0x267   :  { %v739_v36 = vpop.f32.mrf.mxu3  ;;  %2681 = vperm.xlu2 %3307, %v2633_v59  }
 0x268   :  { %v759_v18 = vadd.f32 %v739_v36, %v3733_v50  ;;  %3010 = vmatmul.msk.bf16.gmra.mxu0 %vm393_vm2, %v1285_v16 }
 0x269   :  { %2706 = vperm.xlu1 %3306, %v2638_v8  }
 0x26d   :  { %v3883_v50 = vpop.f32.mrf.mxu0 }
 0x26f   :  { %v3885_v17 = vpop.f32.mrf.mxu3  ;;  %2696 = vperm.xlu2 %3307, %v2636_v39  }
 0x275   :  { %v866_v62 = vpop.f32.mrf.mxu0 }
 0x276   :  { %v3895_v21 = vadd.f32 %v866_v62, %v3803_v26 }
 0x277   :  { %v744_v63 = vpop.f32.mrf.mxu3  ;;  %2711 = vperm.xlu2 %3307, %v2639_v52   ;;  %v1689_v52 = vld [vmem:[%s4618_s2] sm:$0xf] }
 0x278   :  { %v761_v0 = vadd.f32 %v744_v63, %v3747_v13  ;;  %3011 = vmatmul.msk.bf16.gmra.mxu0 %vm393_vm2, %v1287_v57  ;;  %v1288_v13 = vrot.slane %v3697_v56, 1 }
 0x27a   :  { %v1289_v3 = vsel %vm534_vm4, %v1286_v30, %v1288_v13  ;;  %v3944_v30 = vpop.f32.mrf.mxu2 }
 0x27d   :  { %v3903_v5 = vpop.f32.mrf.mxu0 }
 0x27f   :  { %v3905_v7 = vpop.f32.mrf.mxu3 }
 0x282   :  { %v3950_v57 = vpop.f32.mrf.mxu2 }
 0x285   :  { %v871_v26 = vpop.f32.mrf.mxu0 }
 0x286   :  { %v3911_v9 = vadd.f32 %v871_v26, %v757_v37 }
 0x287   :  { %v1222_v29 = vpop.f32.mrf.mxu3 }
 0x288   :  { %v1257_v27 = vadd.f32 %v1222_v29, %v3817_v48  ;;  %3012 = vmatmul.msk.bf16.gmra.mxu0 %vm393_vm2, %v1289_v3 }
 0x28a   :  { %v3956_v26 = vpop.f32.mrf.mxu2 }
 0x28d   :  { %v3919_v28 = vpop.f32.mrf.mxu0 }
 0x28f   :  { %v3921_v23 = vpop.f32.mrf.mxu3 }
 0x295   :  { %v876_v56 = vpop.f32.mrf.mxu0 }
 0x296   :  { %v3923_v6 = vadd.f32 %v876_v56, %v759_v18  ;;  %v3014_v56 = vld [vmem:[%s4618_s2 + $0x4] sm:$0xf] }
 0x297   :  { %v1227_v37 = vpop.f32.mrf.mxu3 }
 0x298   :  { %v1259_v24 = vadd.f32 %v1227_v37, %v1122_v14  ;;  %3013 = vmatmul.msk.bf16.gmra.mxu0 %vm393_vm2, %v1288_v13  ;;  %v964_v14 = vpop.f32.mrf.mxu1  ;;  %v1848_v37 = vsel %vm1788_vm5, %v1689_v52, 0  ;;  %v988_v52 = vadd.f32 %v3819_v51, %v3821_v40  ;;  %v990_v51 = vadd.f32 %v959_v10, %v3852_v32 }
 0x299   :  { %1857 = vmatpush.bf16.msra.mxu2 %v1848_v37  ;;  %v991_v32 = vadd.f32 %v962_v31, %v3869_v46  ;;  %v1405_v46 = vpop.permute.xlu0 %1404 }
 0x29d   :  { %v3926_v48 = vpop.f32.mrf.mxu0 }
 0x29f   :  { %v3934_v15 = vpop.f32.mrf.mxu3 }
 0x2a0   :  { %v967_v8 = vpop.f32.mrf.mxu1 }
 0x2a5   :  { %v881_v38 = vpop.f32.mrf.mxu0 }
 0x2a6   :  { %v3928_v58 = vadd.f32 %v881_v38, %v761_v0 }
 0x2a7   :  { %v3940_v42 = vpop.f32.mrf.mxu3 }
 0x2a8   :  { %v969_v63 = vpop.f32.mrf.mxu1 }
 0x2ad   :  { %v3930_v11 = vpop.f32.mrf.mxu0 }
 0x2ae   :  { %4621 = vst [vmem:[#allocation4_spill] sm:$0xff] %v3930_v11 }
 0x2af   :  { %v3946_v62 = vpop.f32.mrf.mxu3 }
 0x2b0   :  { %v972_v39 = vpop.f32.mrf.mxu1 }
 0x2b5   :  { %v1323_v36 = vpop.f32.mrf.mxu0 }
 0x2b6   :  { %v3936_v18 = vadd.f32 %v1323_v36, %v1257_v27  ;;  %v1107_v36 = vpop.f32.mrf.mxu2 }
 0x2b7   :  { %v3952_v59 = vpop.f32.mrf.mxu3 }
 0x2b8   :  { %4622 = vst [vmem:[#allocation5_spill] sm:$0xff] %v3952_v59  ;;  %v974_v3 = vpop.f32.mrf.mxu1  ;;  %v511_v59 = vadd.f32 %v3701_v60, %v3703_v61 }
 0x2bd   :  { %v1325_v16 = vpop.f32.mrf.mxu0 }
 0x2bf   :  { %v3958_v29 = vpop.f32.mrf.mxu3 }
 0x2c0   :  { %4624 = vst [vmem:[#allocation7_spill] sm:$0xff] %v3958_v29  ;;  %v977_v29 = vpop.f32.mrf.mxu1 }
 0x2c5   :  { %v1328_v41 = vpop.f32.mrf.mxu0 }
 0x2c6   :  { %v3942_v53 = vadd.f32 %v1328_v41, %v1259_v24  ;;  %v1790_v24 = vsel %vm1788_vm5, %v3014_v56, 0  ;;  %v3982_v56 = vpop.f32.mrf.mxu2 }
 0x2c7   :  { %1799 = vmatpush.bf16.msra.mxu1 %v1790_v24  ;;  %v3972_v41 = vpop.f32.mrf.mxu3 }
 0x2c8   :  { %4627 = vst [vmem:[#allocation10_spill] sm:$0xff] %v3972_v41  ;;  %v979_v24 = vpop.f32.mrf.mxu1  ;;  %v516_v41 = vadd.f32 %v3780_v12, %v3721_v1 }
 0x2ca   :  { %v625_v60 = vadd.f32 %v3725_v33, %v516_v41 }
 0x2cc   :  { %v758_v1 = vadd.f32 %v3854_v35, %v625_v60  ;;  %v4632_v60 = vld [vmem:[#allocation4_spill] sm:$0xff] }
 0x2cd   :  { %v3948_v0 = vpop.f32.mrf.mxu0 }
 0x2ce   :  { %v895_v33 = vadd.f32 %v3919_v28, %v758_v1 }
 0x2cf   :  { %v3984_v37 = vpop.f32.mrf.mxu3 }
 0x2d5   :  { %v3954_v13 = vpop.f32.mrf.mxu0 }
 0x2d6   :  { %4623 = vst [vmem:[#allocation6_spill] sm:$0xff] %v3954_v13  ;;  %v1410_v13 = vpop.permute.xlu1 %1409 }
 0x2d7   :  { %v4012_v35 = vpop.f32.mrf.mxu3 }
 0x2dd   :  { %v3960_v27 = vpop.f32.mrf.mxu0 }
 0x2de   :  { %4625 = vst [vmem:[#allocation8_spill] sm:$0xff] %v3960_v27  ;;  %v506_v27 = vadd.f32 %v3630_v20, %v3634_v44  ;;  %v1121_v44 = vadd.f32 %v3826_v4, %v988_v52  ;;  %v1123_v4 = vadd.f32 %v1092_v54, %v990_v51  ;;  %v995_v54 = vadd.f32 %v972_v39, %v3911_v9 }
 0x2e0   :  { %v1260_v28 = vadd.f32 %v3934_v15, %v1123_v4  ;;  %v1124_v15 = vadd.f32 %v3932_v45, %v991_v32 }
 0x2e5   :  { %v3970_v38 = vpop.f32.mrf.mxu0 }
 0x2e6   :  { %4626 = vst [vmem:[#allocation9_spill] sm:$0xff] %v3970_v38  ;;  %v621_v38 = vadd.f32 %v3632_v43, %v506_v27  ;;  %v1258_v27 = vadd.f32 %v3921_v23, %v1121_v44  ;;  %v982_v23 = vpop.f32.mrf.mxu1 }
 0x2e8   :  { %v754_v20 = vadd.f32 %v3790_v22, %v621_v38  ;;  %v1359_v12 = vadd.f32 %v1325_v16, %v1258_v27  ;;  %v627_v22 = vadd.f32 %v3740_v49, %v3736_v25  ;;  %v993_v25 = vadd.f32 %v967_v8, %v3895_v21  ;;  %v1420_v38 = vpop.permute.xlu1 %1419  ;;  %v4633_v27 = vld [vmem:[#allocation7_spill] sm:$0xff] }
 0x2e9   :  { %v996_v16 = vadd.f32 %v974_v3, %v895_v33  ;;  %v4629_v3 = vld [vmem:[#allocation6_spill] sm:$0xff] }
 0x2ea   :  { %v891_v43 = vadd.f32 %v3883_v50, %v754_v20  ;;  %v4010_v50 = vld [vmem:[%s4616_s3] ss:$0 sm:$0xff] }
 0x2eb   :  { %v4019_v31 = vadd.f32 %v4010_v50, %v1359_v12  ;;  %v4031_v9 = vadd.f32 %v4010_v50, %v3936_v18  ;;  %v4042_v45 = vadd.f32 %v4010_v50, %v3942_v53  ;;  %v1128_v18 = vadd.f32 %v3956_v26, %v995_v54  ;;  %v4630_v53 = vld [vmem:[#allocation5_spill] sm:$0xff]  ;;  %v1430_v12 = vpop.permute.xlu0 %1429 }
 0x2ec   :  { %v992_v10 = vadd.f32 %v964_v14, %v891_v43  ;;  %v629_v14 = vadd.f32 %v3786_v34, %v3751_v19  ;;  %v997_v19 = vadd.f32 %v977_v29, %v3923_v6  ;;  %v1126_v34 = vadd.f32 %v3944_v30, %v993_v25  ;;  %v1249_v43 = vpop.f32.mrf.mxu3 }
 0x2ed   :  { %v3974_v11 = vpop.f32.mrf.mxu0  ;;  %v1522_v39 = vmul.f32 %v4019_v31, %v4019_v31  ;;  %v1129_v30 = vadd.f32 %v1107_v36, %v996_v16  ;;  %v1473_v29 = vmul.f32 %v1410_v13, %v4019_v31  ;;  %v1523_v51 = vmul.f32 %v4042_v45, %v4042_v45 }
 0x2ee   :  { %4628 = vst [vmem:[#allocation11_spill] sm:$0xff] %v3974_v11  ;;  %v623_v11 = vadd.f32 %v3706_v2, %v511_v59  ;;  %v1125_v8 = vadd.f32 %v3938_v47, %v992_v10  ;;  %v1263_v52 = vadd.f32 %v4630_v53, %v1126_v34  ;;  %v984_v25 = vpop.f32.mrf.mxu1 }
 0x2ef   :  { %v1488_v10 = vsel %vm1486_vm6, %v1473_v29, 0.0 }
 0x2f0   :  { %v756_v61 = vadd.f32 %v3823_v55, %v623_v11  ;;  %v4004_v55 = vpop.permute.xlu2 %1414  ;;  %v1112_v11 = vpop.f32.mrf.mxu2 }
 0x2f1   :  { %v1435_v54 = vpop.permute.xlu1 %1434 }
 0x2f2   :  { %v893_v2 = vadd.f32 %v3903_v5, %v756_v61  ;;  %v760_v5 = vadd.f32 %v3885_v17, %v627_v22  ;;  %v1361_v17 = vadd.f32 %v3948_v0, %v1260_v28  ;;  %v1261_v0 = vadd.f32 %v3940_v42, %v1124_v15  ;;  %v4635_v28 = vld [vmem:[#allocation10_spill] sm:$0xff] }
 0x2f3   :  { %v1521_v42 = vmul.f32 %v4031_v9, %v4031_v9  ;;  %v1536_v61 = vmul.f32 %v1522_v39, %v1410_v13  ;;  %v1537_v15 = vmul.f32 %v1523_v51, %v4004_v55  ;;  %v1266_v39 = vadd.f32 %v3984_v37, %v1129_v30 }
 0x2f4   :  { %v994_v49 = vadd.f32 %v969_v63, %v893_v2  ;;  %v897_v59 = vadd.f32 %v3926_v48, %v760_v5  ;;  %v762_v63 = vadd.f32 %v3905_v7, %v629_v14  ;;  %v1262_v7 = vadd.f32 %v3946_v62, %v1125_v8  ;;  %v4631_v62 = vld [vmem:[#allocation8_spill] sm:$0xff] }
 0x2f5   :  { %v3995_v40 = vpop.f32.mrf.mxu0  ;;  %v4047_v6 = vadd.f32 %v4010_v50, %v1361_v17  ;;  %v1362_v41 = vadd.f32 %v4629_v3, %v1261_v0  ;;  %v1535_v32 = vmul.f32 %v1521_v42, %v1405_v46  ;;  %v1550_v17 = vsel %vm1486_vm6, %v1536_v61, 0.0 }
 0x2f6   :  { %v1127_v48 = vadd.f32 %v3950_v57, %v994_v49  ;;  %v998_v47 = vadd.f32 %v979_v24, %v897_v59  ;;  %v999_v57 = vadd.f32 %v982_v23, %v3928_v58  ;;  %v1130_v24 = vadd.f32 %v3982_v56, %v997_v19  ;;  %v4634_v56 = vld [vmem:[#allocation9_spill] sm:$0xff] }
 0x2f7   :  { %v1363_v20 = vadd.f32 %v4631_v62, %v1262_v7  ;;  %v899_v36 = vadd.f32 %v4632_v60, %v762_v63  ;;  %v1472_v58 = vmul.f32 %v1405_v46, %v4031_v9  ;;  %v1524_v2 = vmul.f32 %v4047_v6, %v4047_v6  ;;  %v1252_v60 = vpop.f32.mrf.mxu3 }
 0x2f8   :  { %v1425_v26 = vpop.permute.xlu2 %1424  ;;  %v1115_v44 = vpop.f32.mrf.mxu2  ;;  %v1264_v1 = vadd.f32 %v4633_v27, %v1127_v48  ;;  %v1131_v22 = vadd.f32 %v1112_v11, %v998_v47  ;;  %v1364_v33 = vadd.f32 %v4634_v56, %v1263_v52  ;;  %v4067_v5 = vadd.f32 %v4010_v50, %v1362_v41  ;;  %v4636_v11 = vld [vmem:[#allocation11_spill] sm:$0xff] }
 0x2f9   :  { %v1132_v13 = vadd.f32 %v1115_v44, %v999_v57  ;;  %v1474_v49 = vmul.f32 %v4004_v55, %v4042_v45  ;;  %v1265_v23 = vadd.f32 %v4635_v28, %v1128_v18  ;;  %v4073_v14 = vadd.f32 %v4010_v50, %v1363_v20 }
 0x2fa   :  { %v1365_v16 = vadd.f32 %v4636_v11, %v1264_v1  ;;  %v4076_v59 = vadd.f32 %v984_v25, %v899_v36  ;;  %v1487_v46 = vsel %vm1486_vm6, %v1472_v58, 0.0  ;;  %v1475_v8 = vmul.f32 %v1420_v38, %v4047_v6  ;;  %v1445_v36 = vpop.permute.xlu0 %1444 }
 0x2fb   :  { %v1538_v63 = vmul.f32 %v1524_v2, %v1420_v38  ;;  %v4083_v19 = vadd.f32 %v4010_v50, %v1364_v33  ;;  %v1366_v34 = vadd.f32 %v3995_v40, %v1265_v23  ;;  %v1549_v48 = vsel %vm1486_vm6, %v1535_v32, 0.0 }
 0x2fc   :  { %v1489_v0 = vadd.f32 %v1488_v10, %v1487_v46  ;;  %v1525_v18 = vmul.f32 %v4067_v5, %v4067_v5  ;;  %v1551_v47 = vadd.f32 %v1550_v17, %v1549_v48  ;;  %v1490_v7 = vsel %vm1486_vm6, %v1474_v49, 0.0 }
 0x2fd   :  { %v4025_v21 = vpop.f32.mrf.mxu0  ;;  %v1526_v55 = vmul.f32 %v4073_v14, %v4073_v14  ;;  %v4094_v38 = vadd.f32 %v4010_v50, %v1365_v16  ;;  %v1552_v57 = vsel %vm1486_vm6, %v1537_v15, 0.0  ;;  %v1476_v40 = vmul.f32 %v1425_v26, %v4067_v5 }
 0x2fe   :  { %v1267_v42 = vadd.f32 %v4012_v35, %v1130_v24  ;;  %v1367_v37 = vadd.f32 %v4025_v21, %v1266_v39  ;;  %v1492_v30 = vsel %vm1486_vm6, %v1475_v8, 0.0  ;;  %v1554_v29 = vsel %vm1486_vm6, %v1538_v63, 0.0 }
 0x2ff   :  { %v1527_v41 = vmul.f32 %v4083_v19, %v4083_v19  ;;  %v4105_v53 = vadd.f32 %v4010_v50, %v1366_v34  ;;  %v1539_v62 = vmul.f32 %v1525_v18, %v1425_v26  ;;  %v1477_v20 = vmul.f32 %v1430_v12, %v4073_v14 }
 0x300   :  { %v1440_v3 = vpop.permute.xlu2 %1439  ;;  %v1268_v44 = vadd.f32 %v1249_v43, %v1131_v22  ;;  %v1491_v24 = vadd.f32 %v1490_v7, %v1489_v0  ;;  %v1553_v21 = vadd.f32 %v1552_v57, %v1551_v47  ;;  %v1540_v58 = vmul.f32 %v1526_v55, %v1430_v12  ;;  %v1450_v43 = vpop.permute.xlu1 %1449 }
 0x301   :  { %v1528_v61 = vmul.f32 %v4094_v38, %v4094_v38  ;;  %v1494_v51 = vsel %vm1486_vm6, %v1476_v40, 0.0  ;;  %v1478_v27 = vmul.f32 %v1435_v54, %v4083_v19  ;;  %v4113_v1 = vadd.f32 %v4010_v50, %v1367_v37  ;;  %v1117_v40 = vpop.f32.mrf.mxu2 }
 0x302   :  { %v1493_v2 = vadd.f32 %v1492_v30, %v1491_v24  ;;  %v1555_v56 = vadd.f32 %v1554_v29, %v1553_v21  ;;  %v1541_v22 = vmul.f32 %v1527_v41, %v1435_v54  ;;  %v1529_v33 = vmul.f32 %v4105_v53, %v4105_v53  ;;  %v1460_v41 = vpop.permute.xlu0 %1459 }
 0x303   :  { %v1556_v12 = vsel %vm1486_vm6, %v1539_v62, 0.0  ;;  %v1479_v32 = vmul.f32 %v1440_v3, %v4094_v38  ;;  %v1558_v49 = vsel %vm1486_vm6, %v1540_v58, 0.0  ;;  %v1542_v28 = vmul.f32 %v1528_v61, %v1440_v3 }
 0x304   :  { %v1495_v25 = vadd.f32 %v1494_v51, %v1493_v2  ;;  %v1480_v23 = vmul.f32 %v1445_v36, %v4105_v53  ;;  %v1498_v54 = vsel %vm1486_vm6, %v1478_v27, 0.0  ;;  %v1269_v11 = vadd.f32 %v1252_v60, %v1132_v13 }
 0x305   :  { %v1348_v4 = vpop.f32.mrf.mxu0  ;;  %v1530_v16 = vmul.f32 %v4113_v1, %v4113_v1  ;;  %v1557_v17 = vadd.f32 %v1556_v12, %v1555_v56  ;;  %v1560_v8 = vsel %vm1486_vm6, %v1541_v22, 0.0  ;;  %v1543_v63 = vmul.f32 %v1529_v33, %v1445_v36 }
 0x306   :  { %v1368_v35 = vadd.f32 %v1348_v4, %v1267_v42  ;;  %v1496_v4 = vsel %vm1486_vm6, %v1477_v20, 0.0  ;;  %v1500_v48 = vsel %vm1486_vm6, %v1479_v32, 0.0  ;;  %v1481_v0 = vmul.f32 %v1450_v43, %v4113_v1  ;;  %v1254_v42 = vpop.f32.mrf.mxu3 }
 0x307   :  { %v1497_v15 = vadd.f32 %v1496_v4, %v1495_v25  ;;  %v1559_v47 = vadd.f32 %v1558_v49, %v1557_v17  ;;  %v1562_v55 = vsel %vm1486_vm6, %v1542_v28, 0.0  ;;  %v1502_v57 = vsel %vm1486_vm6, %v1480_v23, 0.0 }
 0x308   :  { %v4121_v10 = vadd.f32 %v4010_v50, %v1368_v35  ;;  %v1455_v18 = vpop.permute.xlu2 %1454  ;;  %v1544_v37 = vmul.f32 %v1530_v16, %v1450_v43  ;;  %v1133_v20 = vadd.f32 %v1117_v40, %v4076_v59  ;;  %v1504_v60 = vsel %vm1486_vm6, %v1481_v0, 0.0  ;;  %v1465_v36 = vpop.permute.xlu1 %1464 }
 0x309   :  { %v1499_v7 = vadd.f32 %v1498_v54, %v1497_v15 }
 0x30a   :  { %v1531_v39 = vmul.f32 %v4121_v10, %v4121_v10  ;;  %v1482_v30 = vmul.f32 %v1455_v18, %v4121_v10  ;;  %v1270_v61 = vadd.f32 %v1254_v42, %v1133_v20  ;;  %v1566_v27 = vsel %vm1486_vm6, %v1544_v37, 0.0 }
 0x30b   :  { %v1501_v62 = vadd.f32 %v1500_v48, %v1499_v7 }
 0x30c   :  { %v1545_v35 = vmul.f32 %v1531_v39, %v1455_v18 }
 0x30d   :  { %v1350_v52 = vpop.f32.mrf.mxu0  ;;  %v1503_v51 = vadd.f32 %v1502_v57, %v1501_v62 }
 0x30e   :  { %v1369_v26 = vadd.f32 %v1350_v52, %v1268_v44  ;;  %v1561_v52 = vadd.f32 %v1560_v8, %v1559_v47  ;;  %v1564_v44 = vsel %vm1486_vm6, %v1543_v63, 0.0  ;;  %v1568_v33 = vsel %vm1486_vm6, %v1545_v35, 0.0 }
 0x30f   :  { %v1505_v43 = vadd.f32 %v1504_v60, %v1503_v51 }
 0x310   :  { %v4129_v46 = vadd.f32 %v4010_v50, %v1369_v26  ;;  %v1563_v58 = vadd.f32 %v1562_v55, %v1561_v52  ;;  %v1506_v26 = vsel %vm1486_vm6, %v1482_v30, 0.0 }
 0x311   :  { %v1507_v49 = vadd.f32 %v1506_v26, %v1505_v43 }
 0x312   :  { %v1532_v29 = vmul.f32 %v4129_v46, %v4129_v46  ;;  %v1483_v24 = vmul.f32 %v1460_v41, %v4129_v46  ;;  %v1565_v56 = vadd.f32 %v1564_v44, %v1563_v58  ;;  %v3043_v58 = vld [vmem:[%s4618_s2 + $0x8] sm:$0xf] }
 0x313   :  { %v1925_v51 = vsel %vm1788_vm5, %v3043_v58, 0 }
 0x314   :  { %v1546_v2 = vmul.f32 %v1532_v29, %v1460_v41  ;;  %v1508_v12 = vsel %vm1486_vm6, %v1483_v24, 0.0  ;;  %v1567_v25 = vadd.f32 %v1566_v27, %v1565_v56  ;;  %1934 = vmatpush.bf16.msrb.mxu3 %v1925_v51 }
 0x315   :  { %v1353_v34 = vpop.f32.mrf.mxu0  ;;  %v1509_v17 = vadd.f32 %v1508_v12, %v1507_v49  ;;  %v3073_v12 = vld [vmem:[%s4618_s2 + $0x10] sm:$0xf]  ;;  %v3050_v49 = vld [vmem:[%s4618_s2 + $0xc] sm:$0xf] }
 0x316   :  { %v1370_v13 = vadd.f32 %v1353_v34, %v1269_v11  ;;  %v1570_v28 = vsel %vm1486_vm6, %v1546_v2, 0.0  ;;  %v1470_v11 = vpop.permute.xlu2 %1469  ;;  %v1569_v16 = vadd.f32 %v1568_v33, %v1567_v25 }
 0x318   :  { %v4142_v3 = vadd.f32 %v4010_v50, %v1370_v13  ;;  %v1571_v34 = vadd.f32 %v1570_v28, %v1569_v16  ;;  %v1600_v28 = vld [vmem:[%s4616_s3 + $0x2] sm:$0x1] }
 0x31a   :  { %v1533_v21 = vmul.f32 %v4142_v3, %v4142_v3  ;;  %v1484_v59 = vmul.f32 %v1465_v36, %v4142_v3 }
 0x31c   :  { %v1547_v4 = vmul.f32 %v1533_v21, %v1465_v36  ;;  %v1510_v23 = vsel %vm1486_vm6, %v1484_v59, 0.0 }
 0x31d   :  { %v1355_v22 = vpop.f32.mrf.mxu0  ;;  %v1511_v48 = vadd.f32 %v1510_v23, %v1509_v17  ;;  %v2041_v23 = vsel %vm1788_vm5, %v3050_v49, 0 }
 0x31e   :  { %v1371_v32 = vadd.f32 %v1355_v22, %v1270_v61  ;;  %v1572_v15 = vsel %vm1486_vm6, %v1547_v4, 0.0  ;;  %v3087_v61 = vld [vmem:[%s4618_s2 + $0x18] sm:$0xf]  ;;  %v1587_v22 = vld [vmem:[%s4616_s3 + $0x1] sm:$0x1]  ;;  %2050 = vmatpush.bf16.msrb.mxu1 %v2041_v23 }
 0x31f   :  { %v1573_v13 = vadd.f32 %v1572_v15, %v1571_v34  ;;  %v2366_v27 = vsel %vm1788_vm5, %v3087_v61, 0 }
 0x320   :  { %v4158_v54 = vadd.f32 %v4010_v50, %v1371_v32  ;;  %2375 = vmatpush.bf16.msra.mxu0 %v2366_v27  ;;  %v2161_v32 = vsel %vm1788_vm5, %v3073_v12, 0 }
 0x321   :  { %2170 = vmatpush.bf16.msrb.mxu2 %v2161_v32 }
 0x322   :  { %v1485_v8 = vmul.f32 %v1470_v11, %v4158_v54  ;;  %v1534_v63 = vmul.f32 %v4158_v54, %v4158_v54 }
 0x324   :  { %v1513_v0 = vsel %vm1512_vm7, %v1485_v8, 0.0  ;;  %v1548_v39 = vmul.f32 %v1534_v63, %v1470_v11 }
 0x325   :  { %v1514_v18 = vadd.f32 %v1513_v0, %v1511_v48 }
 0x326   :  { %v1574_v47 = vsel %vm1512_vm7, %v1548_v39, 0.0 }
 0x327   :  { %v1515_v50 = vrot.slane %v1514_v18, 4  ;;  %v1575_v7 = vadd.f32 %v1574_v47, %v1573_v13 }
 0x329   :  { %v1516_v55 = vadd.f32 %v1515_v50, %v1514_v18  ;;  %v1576_v57 = vrot.slane %v1575_v7, 4 }
 0x32b   :  { %v1517_v40 = vrot.slane %v1516_v55, 2  ;;  %v1577_v42 = vadd.f32 %v1576_v57, %v1575_v7 }
 0x32d   :  { %v1518_v37 = vadd.f32 %v1517_v40, %v1516_v55  ;;  %v1578_v30 = vrot.slane %v1577_v42, 2 }
 0x32f   :  { %v1519_v29 = vrot.slane %v1518_v37, 1  ;;  %v1579_v41 = vadd.f32 %v1578_v30, %v1577_v42 }
 0x331   :  { %v1520_v52 = vadd.f32 %v1519_v29, %v1518_v37  ;;  %v1580_v62 = vrot.slane %v1579_v41, 1 }
 0x333   :  { %v1581_v20 = vadd.f32 %v1580_v62, %v1579_v41  ;;  %v1582_v44 = vmul.f32 0.013888889, %v1520_v52 }
 0x335   :  { %v1583_v60 = vmul.f32 0.013888889, %v1581_v20  ;;  %v1584_v35 = vmul.f32 %v1582_v44, %v1582_v44 }
 0x337   :  { %v1585_v24 = vsub.f32 %v1583_v60, %v1584_v35 }
 0x339   :  { %v1586_v21 = vmax.f32 %v1585_v24, 0.0 }
 0x33b   :  { %v1588_v36 = vadd.f32 1e-05, %v1586_v21 }
 0x33d   :  { %3310 = vrsqrt.f32 %v1588_v36  ;;  %vm1595_vm9 = vweird.f32 %v1588_v36 }
 0x343   :  { %v3311_v26 = vpop.eup %3310 }
 0x344   :  { %v1590_v2 = vmul.f32 %v3311_v26, %v1588_v36  ;;  %vm1596_vm8 = vweird.f32 %v3311_v26 }
 0x345   :  { %vm1597_vm10 = vmor %vm1595_vm9, %vm1596_vm8 }
 0x346   :  { %v1591_v59 = vmul.f32 %v3311_v26, %v1590_v2 }
 0x348   :  { %v1592_v56 = vmul.f32 0.5, %v1591_v59 }
 0x34a   :  { %v1593_v43 = vsub.f32 1.5, %v1592_v56 }
 0x34c   :  { %v1594_v33 = vmul.f32 %v3311_v26, %v1593_v43 }
 0x34e   :  { %v1598_v4 = vsel %vm1597_vm10, %v3311_v26, %v1594_v33 }
 0x34f   :  { %v1599_v25 = vmul.f32 %v1598_v4, %v1587_v22 }
 0x351   :  { %v1601_v11 = vmul.f32 %v1599_v25, %v1582_v44  ;;  %v1603_v16 = vperm.slane %v1599_v25, 0 }
 0x353   :  { %v1602_v17 = vsub.f32 %v1600_v28, %v1601_v11  ;;  %v1617_v15 = vmul.f32 %v1603_v16, %v4158_v54  ;;  %v1604_v8 = vmul.f32 %v1603_v16, %v4031_v9  ;;  %v1605_v63 = vmul.f32 %v1603_v16, %v4019_v31 }
 0x354   :  { %v1606_v34 = vmul.f32 %v1603_v16, %v4042_v45  ;;  %v1607_v48 = vmul.f32 %v1603_v16, %v4047_v6  ;;  %v1608_v39 = vmul.f32 %v1603_v16, %v4067_v5  ;;  %v1609_v13 = vmul.f32 %v1603_v16, %v4073_v14 }
 0x355   :  { %v1618_v0 = vperm.slane %v1602_v17, 0  ;;  %v1610_v18 = vmul.f32 %v1603_v16, %v4083_v19  ;;  %v1611_v47 = vmul.f32 %v1603_v16, %v4094_v38  ;;  %v1612_v54 = vmul.f32 %v1603_v16, %v4105_v53 }
 0x356   :  { %v1613_v50 = vmul.f32 %v1603_v16, %v4113_v1  ;;  %v1616_v9 = vmul.f32 %v1603_v16, %v4142_v3  ;;  %v1614_v53 = vmul.f32 %v1603_v16, %v4121_v10  ;;  %v1615_v60 = vmul.f32 %v1603_v16, %v4129_v46 }
 0x357   :  { %v1632_v31 = vadd.f32 %v1618_v0, %v1617_v15  ;;  %v1619_v7 = vadd.f32 %v1618_v0, %v1604_v8  ;;  %v1620_v45 = vadd.f32 %v1618_v0, %v1605_v63  ;;  %v1621_v55 = vadd.f32 %v1618_v0, %v1606_v34 }
 0x358   :  { %v1622_v6 = vadd.f32 %v1618_v0, %v1607_v48  ;;  %v1623_v57 = vadd.f32 %v1618_v0, %v1608_v39  ;;  %v1624_v40 = vadd.f32 %v1618_v0, %v1609_v13  ;;  %v1625_v5 = vadd.f32 %v1618_v0, %v1610_v18 }
 0x359   :  { %v1646_v42 = vmax.f32 %v1632_v31, 0.0  ;;  %v1633_v14 = vmax.f32 %v1619_v7, 0.0  ;;  %v1634_v37 = vmax.f32 %v1620_v45, 0.0  ;;  %v1635_v19 = vmax.f32 %v1621_v55, 0.0 }
 0x35a   :  { %v1636_v30 = vmax.f32 %v1622_v6, 0.0  ;;  %v1637_v38 = vmax.f32 %v1623_v57, 0.0  ;;  %v1626_v29 = vadd.f32 %v1618_v0, %v1611_v47  ;;  %v1638_v52 = vmax.f32 %v1624_v40, 0.0 }
 0x35b   :  { %v1660_v1 = vpack.c.bf16 %v1646_v42, %v1646_v42  ;;  %v1647_v41 = vpack.c.bf16 %v1633_v14, %v1633_v14  ;;  %v1648_v3 = vpack.c.bf16 %v1634_v37, %v1634_v37  ;;  %v1649_v62 = vpack.c.bf16 %v1635_v19, %v1635_v19 }
 0x35c   :  { %v1650_v20 = vpack.c.bf16 %v1636_v30, %v1636_v30  ;;  %v1639_v44 = vmax.f32 %v1625_v5, 0.0  ;;  %v1640_v35 = vmax.f32 %v1626_v29, 0.0  ;;  %v1627_v24 = vadd.f32 %v1618_v0, %v1612_v54 }
 0x35d   :  { %1676 = vst.msk [vmem:[#allocation3 + $0x34] sm:$0x7] %vm1675_vm11, %v1660_v1  ;;  %v1628_v21 = vadd.f32 %v1618_v0, %v1613_v50  ;;  %v1629_v36 = vadd.f32 %v1618_v0, %v1614_v53  ;;  %v1651_v58 = vpack.c.bf16 %v1637_v38, %v1637_v38  ;;  %v1630_v61 = vadd.f32 %v1618_v0, %v1615_v60 }
 0x35e   :  { %1662 = vst.msk [vmem:[#allocation3] sm:$0xf] %vm1661_vm12, %v1647_v41  ;;  %v1631_v10 = vadd.f32 %v1618_v0, %v1616_v9  ;;  %v1652_v51 = vpack.c.bf16 %v1638_v52, %v1638_v52  ;;  %v1641_v27 = vmax.f32 %v1627_v24, 0.0  ;;  %v1653_v2 = vpack.c.bf16 %v1639_v44, %v1639_v44 }
 0x35f   :  { %1663 = vst.msk [vmem:[#allocation3 + $0x4] sm:$0xf] %vm1661_vm12, %v1648_v3  ;;  %v1642_v26 = vmax.f32 %v1628_v21, 0.0  ;;  %v1643_v46 = vmax.f32 %v1629_v36, 0.0  ;;  %v1654_v59 = vpack.c.bf16 %v1640_v35, %v1640_v35  ;;  %v1644_v56 = vmax.f32 %v1630_v61, 0.0 }
 0x360   :  { %1664 = vst.msk [vmem:[#allocation3 + $0x8] sm:$0xf] %vm1661_vm12, %v1649_v62  ;;  %v1655_v43 = vpack.c.bf16 %v1641_v27, %v1641_v27  ;;  %v1645_v33 = vmax.f32 %v1631_v10, 0.0 }
 0x361   :  { %1665 = vst.msk [vmem:[#allocation3 + $0xc] sm:$0xf] %vm1661_vm12, %v1650_v20  ;;  %v1656_v22 = vpack.c.bf16 %v1642_v26, %v1642_v26  ;;  %v1657_v12 = vpack.c.bf16 %v1643_v46, %v1643_v46  ;;  %v1658_v32 = vpack.c.bf16 %v1644_v56, %v1644_v56 }
 0x362   :  { %1666 = vst.msk [vmem:[#allocation3 + $0x10] sm:$0xf] %vm1661_vm12, %v1651_v58  ;;  %v1659_v11 = vpack.c.bf16 %v1645_v33, %v1645_v33 }
 0x363   :  { %1667 = vst.msk [vmem:[#allocation3 + $0x14] sm:$0xf] %vm1661_vm12, %v1652_v51 }
 0x364   :  { %1668 = vst.msk [vmem:[#allocation3 + $0x18] sm:$0xf] %vm1661_vm12, %v1653_v2  ;;  %v2419_v55 = vld [vmem:[#allocation3 + $0x34] sm:$0x7] }
 0x365   :  { %v3223_v4 = vld [vmem:[#allocation3] sm:$0xe]  ;;  %1669 = vst.msk [vmem:[#allocation3 + $0x1c] sm:$0xf] %vm1661_vm12, %v1654_v59  ;;  %v2423_v38 = vunpack.c.l.b16 %v2419_v55 }
 0x366   :  { %v3196_v25 = vld [vmem:[#allocation3] sm:$0xff]   ;;  %1670 = vst.msk [vmem:[#allocation3 + $0x20] sm:$0xf] %vm1661_vm12, %v1655_v43 }
 0x367   :  { %v3222_v49 = vld [vmem:[#allocation3] sm:$0xf0]  ;;  %v1726_v28 = vshll.u32 %v3196_v25, 16  ;;  %3037 = vmatmul.msk.bf16.vlgmr.msra.gmra.mxu2 %vm1486_vm6, %v3196_v25  ;;  %1671 = vst.msk [vmem:[#allocation3 + $0x24] sm:$0xf] %vm1661_vm12, %v1656_v22  ;;  %v1724_v15 = vshrl.u32 %v3196_v25, 16 }
 0x368   :  { %v3224_v23 = vor.u32 %v3223_v4, %v3222_v49  ;;  %v3225_v16 = vld [vmem:[#allocation3 + $0x8] sm:$0xff]   ;;  %1672 = vst.msk [vmem:[#allocation3 + $0x28] sm:$0xf] %vm1661_vm12, %v1657_v12 }
 0x369   :  { %v3139_v17 = vld [vmem:[#allocation3 + $0x8] sm:$0xff]  ;;  %v1728_v8 = vrot.slane %v1726_v28, 1  ;;  %3104 = vmatmul.msk.bf16.vlgmr.msra.gmra.mxu0 %vm1486_vm6, %v3225_v16  ;;  %1673 = vst.msk [vmem:[#allocation3 + $0x2c] sm:$0xf] %vm1661_vm12, %v1658_v32  ;;  %v2427_v50 = vshll.u32 %v3225_v16, 16  ;;  %v2425_v14 = vshrl.u32 %v3225_v16, 16 }
 0x36a   :  { %v1895_v63 = vrot.slane %v3224_v23, 1  ;;  %v1896_v34 = vrot.slane %v3139_v17, 1  ;;  %v1731_v48 = vshll.u32 %v3139_v17, 16  ;;  %1674 = vst.msk [vmem:[#allocation3 + $0x30] sm:$0xf] %vm1661_vm12, %v1659_v11  ;;  %v4220_v47 = vld [vmem:[#allocation3 + $0x10] sm:$0xff] }
 0x36b   :  { %v1729_v0 = vor.u32 %v1728_v8, %v1724_v15  ;;  %v4223_v54 = vld [vmem:[#allocation3 + $0x10] sm:$0xff]  ;;  %v1898_v9 = vrot.slane %v4220_v47, 1  ;;  %v1735_v31 = vshrl.u32 %v3139_v17, 16  ;;  %v1739_v7 = vshll.u32 %v4220_v47, 16 }
 0x36c   :  { %v1897_v39 = vsel %vm534_vm4, %v1895_v63, %v1896_v34  ;;  %v1733_v13 = vrot.slane %v1731_v48, 1  ;;  %v2429_v6 = vrot.slane %v2427_v50, 1  ;;  %v3148_v5 = vld [vmem:[#allocation3 + $0x18] sm:$0xff]  ;;  %v2546_v29 = vrot.slane %v4223_v54, 1 }
 0x36d   :  { %3044 = vmatmul.msk.bf16.vlgmr.msrb.gmra.mxu3 %vm1486_vm6, %v1897_v39  ;;  %v1899_v57 = vsel %vm534_vm4, %v1896_v34, %v1898_v9  ;;  %v1741_v40 = vrot.slane %v1739_v7, 1  ;;  %v2431_v53 = vshll.u32 %v4223_v54, 16  ;;  %v2548_v41 = vrot.slane %v3148_v5, 1  ;;  %v3141_v3 = vld [vmem:[#allocation3 + $0x18] sm:$0xff] }
 0x36e   :  { %v1734_v18 = vsel %vm337_vm3, %v1729_v0, %v1733_v13  ;;  %v1737_v45 = vor.u32 %v1735_v31, %v1733_v13  ;;  %v3149_v19 = vld [vmem:[#allocation3 + $0x20] sm:$0xff]  ;;  %v2430_v1 = vor.u32 %v2429_v6, %v2425_v14  ;;  %v2435_v44 = vshrl.u32 %v4223_v54, 16 }
 0x36f   :  { %3031 = vmatmul.msk.bf16.vlgmr.msra.gmra.mxu1 %vm1486_vm6, %v1734_v18  ;;  %v2433_v62 = vrot.slane %v2431_v53, 1  ;;  %v4243_v20 = vsel %vm534_vm4, %v2546_v29, %v2548_v41  ;;  %v2438_v60 = vshll.u32 %v3148_v5, 16  ;;  %v2550_v24 = vrot.slane %v3149_v19, 1  ;;  %v3142_v39 = vld [vmem:[#allocation3 + $0x20] sm:$0xff] }
 0x370   :  { %v1742_v37 = vsel %vm337_vm3, %v1737_v45, %v1741_v40  ;;  %v4238_v52 = vld [vmem:[#allocation3 + $0x28] sm:$0xff]  ;;  %v2442_v61 = vshrl.u32 %v3148_v5, 16  ;;  %v1743_v10 = vshrl.u32 %v4220_v47, 16  ;;  %v2445_v27 = vshll.u32 %v3149_v19, 16 }
 0x371   :  { %v4230_v42 = vld [vmem:[#allocation3 + $0x30] sm:$0xf]  ;;  %v4251_v21 = vsel %vm337_vm3, %v2430_v1, %v2433_v62  ;;  %v2437_v36 = vor.u32 %v2435_v44, %v2433_v62  ;;  %v2440_v58 = vrot.slane %v2438_v60, 1  ;;  %v4255_v51 = vsel %vm534_vm4, %v2548_v41, %v2550_v24  ;;  %v1690_v31 = vld [vmem:[#allocation3 + $0x2c] sm:$0x7] }
 0x372   :  { %v2339_v30 = vunpack.c.l.b16 %v4230_v42  ;;  %v1900_v26 = vrot.slane %v3141_v3, 1  ;;  %v2552_v59 = vrot.slane %v4238_v52, 1  ;;  %v2447_v56 = vrot.slane %v2445_v27, 1  ;;  %v1688_v60 = vld [vmem:[#allocation3 + $0x2c] sm:$0x3] }
 0x373   :  { %v4258_v2 = vsel %vm337_vm3, %v2437_v36, %v2440_v58  ;;  %v2444_v46 = vor.u32 %v2442_v61, %v2440_v58  ;;  %v2449_v43 = vshrl.u32 %v3149_v19, 16  ;;  %v2452_v22 = vshll.u32 %v4238_v52, 16  ;;  %v3325_v36 = vld [vmem:[#allocation3 + $0x4] sm:$0xf0]  ;;  %v3110_v58 = vld [vmem:[%s4618_s2 + $0x1c] sm:$0xf] }
 0x374   :  { %v4248_v35 = vpack.c.b16 %v2423_v38, %v2339_v30  ;;  %v1747_v12 = vshll.u32 %v3141_v3, 16  ;;  %v4266_v4 = vsel %vm534_vm4, %v2550_v24, %v2552_v59  ;;  %v2456_v32 = vshrl.u32 %v4238_v52, 16  ;;  %v1978_v24 = vld [vmem:[#allocation3 + $0x4] sm:$0xff]   ;;  %v2314_v61 = vld [vmem:[#allocation3 + $0x34] sm:$0x3] }
 0x375   :  { %v4272_v49 = vsel %vm337_vm3, %v2444_v46, %v2447_v56  ;;  %v2451_v28 = vor.u32 %v2449_v43, %v2447_v56  ;;  %v2454_v23 = vrot.slane %v2452_v22, 1  ;;  %v1745_v16 = vor.u32 %v1743_v10, %v1741_v40  ;;  %v3080_v40 = vld [vmem:[%s4618_s2 + $0x14] sm:$0xf]  ;;  %v3143_v43 = vld [vmem:[#allocation3 + $0xc] sm:$0xff] }
 0x376   :  { %v2554_v33 = vrot.slane %v4248_v35, 1  ;;  %v2460_v25 = vshll.u32 %v4248_v35, 16  ;;  %v1901_v63 = vsel %vm534_vm4, %v1898_v9, %v1900_v26  ;;  %v1749_v34 = vrot.slane %v1747_v12, 1  ;;  %v4294_v9 = vld [vmem:[#allocation3 + $0x28] sm:$0xff]   ;;  %v3326_v12 = vld [vmem:[#allocation3 + $0x4] sm:$0xe] }
 0x377   :  { %3038 = vmatmul.msk.bf16.gmra.mxu2 %vm1486_vm6, %v3139_v17  ;;  %v4282_v15 = vsel %vm337_vm3, %v2451_v28, %v2454_v23  ;;  %v2458_v8 = vor.u32 %v2456_v32, %v2454_v23  ;;  %v1902_v13 = vrot.slane %v3142_v39, 1  ;;  %v1751_v18 = vshrl.u32 %v3141_v3, 16 }
 0x378   :  { %v4277_v11 = vsel %vm534_vm4, %v2552_v59, %v2554_v33  ;;  %v4279_v17 = vrot.slane %v2460_v25, 1  ;;  %v1750_v0 = vsel %vm337_vm3, %v1745_v16, %v1749_v34  ;;  %v1715_v6 = vunpack.c.l.b16 %v4294_v9 }
 0x379   :  { %3105 = vmatmul.msk.bf16.gmra.mxu0 %vm1486_vm6, %v4223_v54  ;;  %v1753_v50 = vor.u32 %v1751_v18, %v1749_v34  ;;  %v1903_v7 = vsel %vm534_vm4, %v1900_v26, %v1902_v13  ;;  %v1759_v53 = vshrl.u32 %v3142_v39, 16  ;;  %v1832_v10 = vunpack.c.l.b16 %v1688_v60 }
 0x37a   :  { %v4288_v48 = vsel %vm337_vm3, %v2458_v8, %v4279_v17  ;;  %v2340_v27 = vunpack.c.l.b16 %v2314_v61  ;;  %v2102_v59 = vshll.u32 %v1978_v24, 16  ;;  %v2100_v25 = vshrl.u32 %v1978_v24, 16 }
 0x37b   :  { %v1833_v26 = vpack.c.b16 %v1832_v10, %v1715_v6  ;;  %v2106_v28 = vshll.u32 %v3143_v43, 16  ;;  %v3327_v8 = vor.u32 %v3326_v12, %v3325_v36  ;;  %v2094_v36 = vld [vmem:[#allocation3 + $0x30] sm:$0x7] }
 0x37c   :  { %v2346_v46 = vpack.c.b16 %v2340_v27, %v2339_v30  ;;  %v2104_v32 = vrot.slane %v2102_v59, 1  ;;  %v2014_v27 = vunpack.c.h.b16 %v4294_v9 }
 0x37d   :  { %3045 = vmatmul.msk.bf16.gmra.mxu3 %vm1486_vm6, %v1899_v57  ;;  %v1716_v57 = vunpack.c.l.b16 %v1690_v31  ;;  %v2108_v16 = vrot.slane %v2106_v28, 1  ;;  %v2220_v30 = vrot.slane %v3327_v8, 1 }
 0x37e   :  { %v2105_v23 = vor.u32 %v2104_v32, %v2100_v25 }
 0x37f   :  { %3032 = vmatmul.msk.bf16.gmra.mxu1 %vm1486_vm6, %v1742_v37  ;;  %v1722_v14 = vpack.c.b16 %v1716_v57, %v1715_v6 }
 0x380   :  { %v2109_v42 = vsel %vm337_vm3, %v2105_v23, %v2108_v16 }
 0x381   :  { %v1763_v37 = vshll.u32 %v1722_v14, 16  ;;  %v1904_v38 = vrot.slane %v1722_v14, 1  ;;  %v1767_v56 = vshrl.u32 %v1722_v14, 16 }
 0x383   :  { %v1905_v62 = vsel %vm534_vm4, %v1902_v13, %v1904_v38 }
 0x387   :  { %3039 = vmatmul.msk.bf16.gmra.mxu2 %vm1486_vm6, %v4220_v47  ;;  %v1755_v47 = vshll.u32 %v3142_v39, 16 }
 0x389   :  { %3106 = vmatmul.msk.bf16.gmra.mxu0 %vm1486_vm6, %v3148_v5  ;;  %v1757_v45 = vrot.slane %v1755_v47, 1  ;;  %v2250_v5 = vsel %vm1788_vm5, %v3080_v40, 0 }
 0x38a   :  { %2259 = vmatpush.bf16.msra.mxu3 %v2250_v5 }
 0x38b   :  { %v1758_v55 = vsel %vm337_vm3, %v1753_v50, %v1757_v45  ;;  %v1761_v41 = vor.u32 %v1759_v53, %v1757_v45  ;;  %v3145_v45 = vld [vmem:[#allocation3 + $0x1c] sm:$0xff]  ;;  %v3146_v53 = vld [vmem:[#allocation3 + $0x24] sm:$0xff] }
 0x38c   :  { %v2120_v6 = vshll.u32 %v3145_v45, 16  ;;  %v2225_v14 = vrot.slane %v3145_v45, 1  ;;  %v2227_v59 = vrot.slane %v3146_v53, 1  ;;  %v2131_v9 = vshrl.u32 %v3146_v53, 16 }
 0x38d   :  { %3046 = vmatmul.msk.bf16.gmra.mxu3 %vm1486_vm6, %v1901_v63  ;;  %v2221_v63 = vrot.slane %v3143_v43, 1 }
 0x38e   :  { %v2122_v40 = vrot.slane %v2120_v6, 1  ;;  %v2228_v32 = vsel %vm534_vm4, %v2225_v14, %v2227_v59 }
 0x38f   :  { %3033 = vmatmul.msk.bf16.gmra.mxu1 %vm1486_vm6, %v1750_v0  ;;  %v2222_v34 = vsel %vm534_vm4, %v2220_v30, %v2221_v63  ;;  %v3144_v0 = vld [vmem:[#allocation3 + $0x14] sm:$0xff] }
 0x390   :  { %v2113_v13 = vshll.u32 %v3144_v0, 16  ;;  %v2223_v31 = vrot.slane %v3144_v0, 1 }
 0x392   :  { %v2115_v47 = vrot.slane %v2113_v13, 1 }
 0x397   :  { %3040 = vmatmul.msk.bf16.gmra.mxu2 %vm1486_vm6, %v3141_v3  ;;  %v1765_v3 = vrot.slane %v1763_v37, 1 }
 0x399   :  { %3107 = vmatmul.msk.bf16.gmra.mxu0 %vm1486_vm6, %v3149_v19  ;;  %v3117_v19 = vld [vmem:[%s4618_s2 + $0x20] sm:$0xf]  ;;  %v1766_v44 = vsel %vm337_vm3, %v1761_v41, %v1765_v3  ;;  %v1769_v22 = vor.u32 %v1767_v56, %v1765_v3  ;;  %v2124_v3 = vshrl.u32 %v3145_v45, 16 }
 0x39a   :  { %v2575_v1 = vsel %vm1788_vm5, %v3117_v19, 0 }
 0x39b   :  { %2584 = vmatpush.bf16.msra.mxu2 %v2575_v1 }
 0x39d   :  { %3047 = vmatmul.msk.bf16.gmra.mxu3 %vm1486_vm6, %v1903_v7  ;;  %v2224_v7 = vsel %vm534_vm4, %v2221_v63, %v2223_v31 }
 0x39f   :  { %3034 = vmatmul.msk.bf16.gmra.mxu1 %vm1486_vm6, %v1758_v55  ;;  %v2117_v55 = vshrl.u32 %v3144_v0, 16 }
 0x3a1   :  { %v2119_v57 = vor.u32 %v2117_v55, %v2115_v47 }
 0x3a3   :  { %v2123_v5 = vsel %vm337_vm3, %v2119_v57, %v2122_v40 }
 0x3a7   :  { %3041 = vmatmul.msk.bf16.gmra.mxu2 %vm1486_vm6, %v3142_v39  ;;  %v2110_v39 = vshrl.u32 %v3143_v43, 16 }
 0x3a9   :  { %3108 = vmatmul.msk.bf16.gmra.mxu0 %vm1486_vm6, %v4238_v52  ;;  %v2486_v52 = vsel %vm1788_vm5, %v3110_v58, 0  ;;  %v2112_v18 = vor.u32 %v2110_v39, %v2108_v16 }
 0x3aa   :  { %2495 = vmatpush.bf16.msra.mxu1 %v2486_v52 }
 0x3ab   :  { %v2116_v50 = vsel %vm337_vm3, %v2112_v18, %v2115_v47 }
 0x3ad   :  { %3048 = vmatmul.msk.bf16.gmra.mxu3 %vm1486_vm6, %v1905_v62  ;;  %v2127_v62 = vshll.u32 %v3146_v53, 16 }
 0x3af   :  { %3035 = vmatmul.msk.bf16.gmra.mxu1 %vm1486_vm6, %v1766_v44  ;;  %v2129_v61 = vrot.slane %v2127_v62, 1  ;;  %v3227_v62 = vld [vmem:[#allocation3 + $0x8] sm:$0xe] }
 0x3b7   :  { %3042 = vmatmul.msk.bf16.gmra.mxu2 %vm1486_vm6, %v1833_v26  ;;  %v2098_v26 = vunpack.c.l.b16 %v2094_v36 }
 0x3b9   :  { %3109 = vmatmul.msk.bf16.gmra.mxu0 %vm1486_vm6, %v2346_v46 }
 0x3bd   :  { %3049 = vmatmul.msk.bf16.gmra.mxu3 %vm1486_vm6, %v1904_v38  ;;  %v2226_v38 = vsel %vm534_vm4, %v2223_v31, %v2225_v14 }
 0x3bf   :  { %3036 = vmatmul.msk.bf16.gmra.mxu1 %vm1486_vm6, %v1769_v22  ;;  %v2099_v22 = vpack.c.b16 %v2098_v26, %v2014_v27 }
 0x3c1   :  { %v2135_v28 = vshll.u32 %v2099_v22, 16  ;;  %v2229_v13 = vrot.slane %v2099_v22, 1  ;;  %v2139_v57 = vshrl.u32 %v2099_v22, 16 }
 0x3c3   :  { %v2137_v30 = vrot.slane %v2135_v28, 1  ;;  %v2230_v31 = vsel %vm534_vm4, %v2227_v59, %v2229_v13 }
 0x3c5   :  { %v2141_v14 = vor.u32 %v2139_v57, %v2137_v30 }
 0x3c7   :  { %3074 = vmatmul.msk.bf16.vlgmr.msrb.gmra.mxu2 %vm1486_vm6, %v2109_v42  ;;  %v2133_v42 = vor.u32 %v2131_v9, %v2129_v61 }
 0x3cd   :  { %3081 = vmatmul.msk.bf16.vlgmr.msra.gmra.mxu3 %vm1486_vm6, %v2222_v34 }
 0x3cf   :  { %3067 = vmatmul.msk.bf16.vlgmr.msrb.gmra.mxu1 %vm1486_vm6, %v1978_v24  ;;  %v2126_v24 = vor.u32 %v2124_v3, %v2122_v40  ;;  %v3226_v3 = vld [vmem:[#allocation3 + $0x8] sm:$0xf0] }
 0x3d0   :  { %v3228_v36 = vor.u32 %v3227_v62, %v3226_v3 }
 0x3d1   :  { %v2130_v10 = vsel %vm337_vm3, %v2126_v24, %v2129_v61 }
 0x3d7   :  { %3075 = vmatmul.msk.bf16.gmra.mxu2 %vm1486_vm6, %v2116_v50 }
 0x3dd   :  { %3082 = vmatmul.msk.bf16.gmra.mxu3 %vm1486_vm6, %v2224_v7 }
 0x3df   :  { %3068 = vmatmul.msk.bf16.gmra.mxu1 %vm1486_vm6, %v3143_v43 }
 0x3e6   :  { %v2377_v57 = vpop.f32.mrf.mxu0 }
 0x3e7   :  { %3076 = vmatmul.msk.bf16.gmra.mxu2 %vm1486_vm6, %v2123_v5 }
 0x3ea   :  { %v1859_v37 = vpop.f32.mrf.mxu2 }
 0x3ec   :  { %v1801_v19 = vpop.f32.mrf.mxu1 }
 0x3ed   :  { %v1860_v1 = vadd.f32 %v1859_v37, %v1801_v19  ;;  %3083 = vmatmul.msk.bf16.gmra.mxu3 %vm1486_vm6, %v2226_v38  ;;  %v1989_v37 = vld [vmem:[#allocation3 + $0x30] sm:$0x3] }
 0x3ef   :  { %3069 = vmatmul.msk.bf16.gmra.mxu1 %vm1486_vm6, %v3144_v0  ;;  %v2138_v0 = vsel %vm337_vm3, %v2133_v42, %v2137_v30 }
 0x3f0   :  { %v1936_v41 = vpop.f32.mrf.mxu3 }
 0x3f1   :  { %v4341_v44 = vadd.f32 %v1936_v41, %v1860_v1  ;;  %v2015_v1 = vunpack.c.l.b16 %v1989_v37 }
 0x3f2   :  { %v1861_v60 = vpop.f32.mrf.mxu2 }
 0x3f3   :  { %v2021_v24 = vpack.c.b16 %v2015_v1, %v2014_v27 }
 0x3f4   :  { %v1803_v58 = vpop.f32.mrf.mxu1 }
 0x3f5   :  { %v1862_v52 = vadd.f32 %v1861_v60, %v1803_v58 }
 0x3f7   :  { %3077 = vmatmul.msk.bf16.gmra.mxu2 %vm1486_vm6, %v2130_v10  ;;  %v2545_v10 = vrot.slane %v3228_v36, 1 }
 0x3f8   :  { %v1938_v46 = vpop.f32.mrf.mxu3 }
 0x3f9   :  { %v4346_v56 = vadd.f32 %v1938_v46, %v1862_v52  ;;  %v2547_v59 = vsel %vm534_vm4, %v2545_v10, %v2546_v29 }
 0x3fa   :  { %v1864_v43 = vpop.f32.mrf.mxu2 }
 0x3fc   :  { %v1806_v12 = vpop.f32.mrf.mxu1 }
 0x3fd   :  { %v1865_v25 = vadd.f32 %v1864_v43, %v1806_v12  ;;  %3084 = vmatmul.msk.bf16.gmra.mxu3 %vm1486_vm6, %v2228_v32 }
 0x3ff   :  { %3070 = vmatmul.msk.bf16.gmra.mxu1 %vm1486_vm6, %v3145_v45 }
 0x400   :  { %v1941_v23 = vpop.f32.mrf.mxu3 }
 0x401   :  { %v4351_v16 = vadd.f32 %v1941_v23, %v1865_v25 }
 0x402   :  { %v1866_v8 = vpop.f32.mrf.mxu2 }
 0x404   :  { %v1808_v63 = vpop.f32.mrf.mxu1 }
 0x405   :  { %v1867_v34 = vadd.f32 %v1866_v8, %v1808_v63 }
 0x407   :  { %3078 = vmatmul.msk.bf16.gmra.mxu2 %vm1486_vm6, %v2138_v0 }
 0x408   :  { %v1943_v39 = vpop.f32.mrf.mxu3 }
 0x409   :  { %v4355_v18 = vadd.f32 %v1943_v39, %v1867_v34 }
 0x40a   :  { %v1869_v47 = vpop.f32.mrf.mxu2 }
 0x40c   :  { %v1811_v50 = vpop.f32.mrf.mxu1 }
 0x40d   :  { %v1870_v7 = vadd.f32 %v1869_v47, %v1811_v50  ;;  %3085 = vmatmul.msk.bf16.gmra.mxu3 %vm1486_vm6, %v2230_v31 }
 0x40f   :  { %3071 = vmatmul.msk.bf16.gmra.mxu1 %vm1486_vm6, %v3146_v53 }
 0x410   :  { %v1946_v45 = vpop.f32.mrf.mxu3 }
 0x411   :  { %v4360_v55 = vadd.f32 %v1946_v45, %v1870_v7 }
 0x412   :  { %v1871_v6 = vpop.f32.mrf.mxu2 }
 0x414   :  { %v1813_v40 = vpop.f32.mrf.mxu1 }
 0x415   :  { %v1872_v5 = vadd.f32 %v1871_v6, %v1813_v40 }
 0x417   :  { %3079 = vmatmul.msk.bf16.gmra.mxu2 %vm1486_vm6, %v2141_v14 }
 0x418   :  { %v1948_v19 = vpop.f32.mrf.mxu3 }
 0x419   :  { %v4363_v38 = vadd.f32 %v1948_v19, %v1872_v5 }
 0x41a   :  { %v1874_v41 = vpop.f32.mrf.mxu2 }
 0x41c   :  { %v1816_v60 = vpop.f32.mrf.mxu1 }
 0x41d   :  { %v1875_v53 = vadd.f32 %v1874_v41, %v1816_v60  ;;  %3086 = vmatmul.msk.bf16.gmra.mxu3 %vm1486_vm6, %v2229_v13 }
 0x41f   :  { %3072 = vmatmul.msk.bf16.gmra.mxu1 %vm1486_vm6, %v2021_v24 }
 0x420   :  { %v1951_v58 = vpop.f32.mrf.mxu3 }
 0x421   :  { %v4367_v61 = vadd.f32 %v1951_v58, %v1875_v53 }
 0x422   :  { %v1876_v52 = vpop.f32.mrf.mxu2 }
 0x424   :  { %v1818_v26 = vpop.f32.mrf.mxu1 }
 0x425   :  { %v1877_v46 = vadd.f32 %v1876_v52, %v1818_v26 }
 0x427   :  { %3118 = vmatmul.msk.bf16.vlgmr.msra.gmra.mxu2 %vm1486_vm6, %v2547_v59 }
 0x428   :  { %v1953_v43 = vpop.f32.mrf.mxu3 }
 0x429   :  { %v4373_v22 = vadd.f32 %v1953_v43, %v1877_v46 }
 0x42a   :  { %v1879_v27 = vpop.f32.mrf.mxu2 }
 0x42c   :  { %v1821_v12 = vpop.f32.mrf.mxu1 }
 0x42d   :  { %v1880_v32 = vadd.f32 %v1879_v27, %v1821_v12 }
 0x42f   :  { %3111 = vmatmul.msk.bf16.vlgmr.msra.gmra.mxu1 %vm1486_vm6, %v4251_v21 }
 0x430   :  { %v1956_v25 = vpop.f32.mrf.mxu3 }
 0x431   :  { %v4377_v28 = vadd.f32 %v1956_v25, %v1880_v32 }
 0x432   :  { %v1881_v23 = vpop.f32.mrf.mxu2 }
 0x434   :  { %v1823_v9 = vpop.f32.mrf.mxu1 }
 0x435   :  { %v1882_v8 = vadd.f32 %v1881_v23, %v1823_v9 }
 0x437   :  { %3119 = vmatmul.msk.bf16.gmra.mxu2 %vm1486_vm6, %v4243_v20 }
 0x438   :  { %v1958_v54 = vpop.f32.mrf.mxu3 }
 0x439   :  { %v4381_v29 = vadd.f32 %v1958_v54, %v1882_v8  ;;  %v2379_v8 = vpop.f32.mrf.mxu0 }
 0x43a   :  { %v1884_v42 = vpop.f32.mrf.mxu2 }
 0x43c   :  { %v1826_v30 = vpop.f32.mrf.mxu1 }
 0x43d   :  { %v1885_v63 = vadd.f32 %v1884_v42, %v1826_v30 }
 0x43f   :  { %3112 = vmatmul.msk.bf16.gmra.mxu1 %vm1486_vm6, %v4258_v2 }
 0x440   :  { %v1961_v34 = vpop.f32.mrf.mxu3 }
 0x441   :  { %v4385_v21 = vadd.f32 %v1961_v34, %v1885_v63  ;;  %v2382_v34 = vpop.f32.mrf.mxu0 }
 0x442   :  { %v1886_v0 = vpop.f32.mrf.mxu2 }
 0x444   :  { %v1828_v39 = vpop.f32.mrf.mxu1 }
 0x445   :  { %v1887_v13 = vadd.f32 %v1886_v0, %v1828_v39 }
 0x447   :  { %3120 = vmatmul.msk.bf16.gmra.mxu2 %vm1486_vm6, %v4255_v51 }
 0x448   :  { %v1963_v47 = vpop.f32.mrf.mxu3 }
 0x449   :  { %v4389_v20 = vadd.f32 %v1963_v47, %v1887_v13 }
 0x44a   :  { %v2172_v50 = vpop.f32.mrf.mxu2 }
 0x44c   :  { %v2052_v31 = vpop.f32.mrf.mxu1 }
 0x44d   :  { %v2082_v7 = vadd.f32 %v2052_v31, %v4341_v44  ;;  %v2384_v31 = vpop.f32.mrf.mxu0 }
 0x44f   :  { %3113 = vmatmul.msk.bf16.gmra.mxu1 %vm1486_vm6, %v4272_v49  ;;  %v2202_v2 = vadd.f32 %v2172_v50, %v2082_v7 }
 0x450   :  { %v2261_v45 = vpop.f32.mrf.mxu3 }
 0x451   :  { %v2291_v6 = vadd.f32 %v2261_v45, %v2202_v2 }
 0x452   :  { %v2174_v40 = vpop.f32.mrf.mxu2 }
 0x453   :  { %v2407_v5 = vadd.f32 %v2377_v57, %v2291_v6 }
 0x454   :  { %v2054_v14 = vpop.f32.mrf.mxu1 }
 0x455   :  { %v2083_v37 = vadd.f32 %v2054_v14, %v4346_v56  ;;  %v2387_v6 = vpop.f32.mrf.mxu0 }
 0x457   :  { %v4395_v51 = vadd.f32 %v2174_v40, %v2083_v37  ;;  %3121 = vmatmul.msk.bf16.gmra.mxu2 %vm1486_vm6, %v4266_v4 }
 0x45a   :  { %v2177_v19 = vpop.f32.mrf.mxu2 }
 0x45c   :  { %v2057_v1 = vpop.f32.mrf.mxu1 }
 0x45d   :  { %v2084_v44 = vadd.f32 %v2057_v1, %v4351_v16 }
 0x45f   :  { %3114 = vmatmul.msk.bf16.gmra.mxu1 %vm1486_vm6, %v4282_v15  ;;  %v4402_v49 = vadd.f32 %v2177_v19, %v2084_v44  ;;  %v2389_v19 = vpop.f32.mrf.mxu0 }
 0x462   :  { %v2179_v41 = vpop.f32.mrf.mxu2 }
 0x464   :  { %v2059_v3 = vpop.f32.mrf.mxu1 }
 0x465   :  { %v2085_v62 = vadd.f32 %v2059_v3, %v4355_v18  ;;  %v2464_v18 = vshrl.u32 %v4248_v35, 16 }
 0x467   :  { %v4405_v60 = vadd.f32 %v2179_v41, %v2085_v62  ;;  %3122 = vmatmul.msk.bf16.gmra.mxu2 %vm1486_vm6, %v4277_v11  ;;  %v2392_v41 = vpop.f32.mrf.mxu0 }
 0x46a   :  { %v2182_v56 = vpop.f32.mrf.mxu2 }
 0x46c   :  { %v2062_v4 = vpop.f32.mrf.mxu1 }
 0x46d   :  { %v2086_v53 = vadd.f32 %v2062_v4, %v4360_v55 }
 0x46f   :  { %3115 = vmatmul.msk.bf16.gmra.mxu1 %vm1486_vm6, %v4288_v48  ;;  %v4412_v16 = vadd.f32 %v2182_v56, %v2086_v53  ;;  %v2466_v48 = vor.u32 %v2464_v18, %v4279_v17  ;;  %v2657_v18 = vpop.permute.xlu0 %2656 }
 0x472   :  { %v2184_v15 = vpop.f32.mrf.mxu2 }
 0x474   :  { %v2064_v24 = vpop.f32.mrf.mxu1 }
 0x475   :  { %v2087_v36 = vadd.f32 %v2064_v24, %v4363_v38 }
 0x477   :  { %v4415_v58 = vadd.f32 %v2184_v15, %v2087_v36  ;;  %3123 = vmatmul.msk.bf16.gmra.mxu2 %vm1486_vm6, %v2554_v33 }
 0x47a   :  { %v2187_v11 = vpop.f32.mrf.mxu2 }
 0x47c   :  { %v2067_v52 = vpop.f32.mrf.mxu1 }
 0x47d   :  { %v2088_v55 = vadd.f32 %v2067_v52, %v4367_v61  ;;  %v2263_v61 = vpop.f32.mrf.mxu3 }
 0x47e   :  { %v2292_v4 = vadd.f32 %v2263_v61, %v4395_v51  ;;  %v4450_v51 = vld [vmem:[%s4619_s4] ss:$0 sm:$0xff] }
 0x47f   :  { %3116 = vmatmul.msk.bf16.gmra.mxu1 %vm1486_vm6, %v2466_v48  ;;  %v4424_v10 = vadd.f32 %v2187_v11, %v2088_v55 }
 0x480   :  { %v2408_v52 = vadd.f32 %v2379_v8, %v2292_v4 }
 0x482   :  { %v2189_v26 = vpop.f32.mrf.mxu2 }
 0x484   :  { %v2069_v38 = vpop.f32.mrf.mxu1 }
 0x485   :  { %v2089_v46 = vadd.f32 %v2069_v38, %v4373_v22  ;;  %v2266_v54 = vpop.f32.mrf.mxu3 }
 0x486   :  { %v2293_v53 = vadd.f32 %v2266_v54, %v4402_v49 }
 0x487   :  { %v4427_v59 = vadd.f32 %v2189_v26, %v2089_v46 }
 0x488   :  { %v2409_v48 = vadd.f32 %v2382_v34, %v2293_v53 }
 0x48a   :  { %v2192_v43 = vpop.f32.mrf.mxu2 }
 0x48c   :  { %v2072_v33 = vpop.f32.mrf.mxu1 }
 0x48d   :  { %v2090_v27 = vadd.f32 %v2072_v33, %v4377_v28  ;;  %v2268_v39 = vpop.f32.mrf.mxu3 }
 0x48e   :  { %v2294_v36 = vadd.f32 %v2268_v39, %v4405_v60 }
 0x48f   :  { %v4430_v35 = vadd.f32 %v2192_v43, %v2090_v27 }
 0x490   :  { %v2410_v43 = vadd.f32 %v2384_v31, %v2294_v36 }
 0x492   :  { %v2194_v12 = vpop.f32.mrf.mxu2 }
 0x494   :  { %v2074_v32 = vpop.f32.mrf.mxu1 }
 0x495   :  { %v2091_v17 = vadd.f32 %v2074_v32, %v4381_v29  ;;  %v2271_v7 = vpop.f32.mrf.mxu3 }
 0x496   :  { %v2295_v55 = vadd.f32 %v2271_v7, %v4412_v16 }
 0x497   :  { %v4433_v25 = vadd.f32 %v2194_v12, %v2091_v17  ;;  %v2662_v12 = vpop.permute.xlu1 %2661 }
 0x498   :  { %v2411_v60 = vadd.f32 %v2387_v6, %v2295_v55 }
 0x49a   :  { %v2197_v23 = vpop.f32.mrf.mxu2 }
 0x49c   :  { %v2077_v9 = vpop.f32.mrf.mxu1 }
 0x49d   :  { %v2092_v22 = vadd.f32 %v2077_v9, %v4385_v21  ;;  %v2273_v57 = vpop.f32.mrf.mxu3 }
 0x49e   :  { %v2296_v38 = vadd.f32 %v2273_v57, %v4415_v58 }
 0x49f   :  { %v4436_v42 = vadd.f32 %v2197_v23, %v2092_v22  ;;  %v2667_v22 = vpop.permute.xlu2 %2666 }
 0x4a0   :  { %v2412_v9 = vadd.f32 %v2389_v19, %v2296_v38  ;;  %v2677_v19 = vpop.permute.xlu1 %2676 }
 0x4a2   :  { %v2199_v30 = vpop.f32.mrf.mxu2 }
 0x4a4   :  { %v2079_v63 = vpop.f32.mrf.mxu1 }
 0x4a5   :  { %v2093_v28 = vadd.f32 %v2079_v63, %v4389_v20  ;;  %v2276_v20 = vpop.f32.mrf.mxu3 }
 0x4a6   :  { %v2297_v33 = vadd.f32 %v2276_v20, %v4424_v10 }
 0x4a7   :  { %v4439_v0 = vadd.f32 %v2199_v30, %v2093_v28  ;;  %v2672_v28 = vpop.permute.xlu0 %2671 }
 0x4a8   :  { %v2413_v63 = vadd.f32 %v2392_v41, %v2297_v33 }
 0x4aa   :  { %v2586_v13 = vpop.f32.mrf.mxu2 }
 0x4ac   :  { %v2497_v29 = vpop.f32.mrf.mxu1 }
 0x4ad   :  { %v2527_v47 = vadd.f32 %v2497_v29, %v2407_v5  ;;  %v2278_v3 = vpop.f32.mrf.mxu3  ;;  %v2394_v5 = vpop.f32.mrf.mxu0 }
 0x4ae   :  { %v2298_v8 = vadd.f32 %v2278_v3, %v4427_v59 }
 0x4af   :  { %v2616_v50 = vadd.f32 %v2586_v13, %v2527_v47 }
 0x4b0   :  { %v2414_v31 = vadd.f32 %v2394_v5, %v2298_v8 }
 0x4b1   :  { %v4454_v10 = vadd.f32 %v4450_v51, %v2616_v50 }
 0x4b2   :  { %v2588_v2 = vpop.f32.mrf.mxu2 }
 0x4b3   :  { %v2755_v59 = vmul.f32 %v4454_v10, %v4454_v10  ;;  %v2714_v3 = vmul.f32 %v2657_v18, %v4454_v10 }
 0x4b4   :  { %v2499_v45 = vpop.f32.mrf.mxu1 }
 0x4b5   :  { %v2281_v15 = vpop.f32.mrf.mxu3  ;;  %v2528_v26 = vadd.f32 %v2499_v45, %v2408_v52  ;;  %v2397_v61 = vpop.f32.mrf.mxu0 }
 0x4b6   :  { %v2299_v34 = vadd.f32 %v2281_v15, %v4430_v35  ;;  %v2682_v15 = vpop.permute.xlu2 %2681 }
 0x4b7   :  { %v2617_v32 = vadd.f32 %v2588_v2, %v2528_v26 }
 0x4b9   :  { %v4458_v39 = vadd.f32 %v4450_v51, %v2617_v32 }
 0x4ba   :  { %v2591_v21 = vpop.f32.mrf.mxu2 }
 0x4bb   :  { %v2756_v35 = vmul.f32 %v4458_v39, %v4458_v39  ;;  %v2715_v20 = vmul.f32 %v2662_v12, %v4458_v39 }
 0x4bc   :  { %v2502_v40 = vpop.f32.mrf.mxu1 }
 0x4bd   :  { %v2529_v46 = vadd.f32 %v2502_v40, %v2409_v48  ;;  %v2283_v16 = vpop.f32.mrf.mxu3  ;;  %v2768_v5 = vmul.f32 %v2756_v35, %v2662_v12  ;;  %v2727_v48 = vsel %vm1486_vm6, %v2715_v20, 0.0 }
 0x4be   :  { %v2300_v6 = vadd.f32 %v2283_v16, %v4433_v25  ;;  %v2697_v20 = vpop.permute.xlu2 %2696 }
 0x4bf   :  { %v2618_v17 = vadd.f32 %v2591_v21, %v2529_v46  ;;  %v2415_v21 = vadd.f32 %v2397_v61, %v2299_v34  ;;  %v2726_v46 = vsel %vm1486_vm6, %v2714_v3, 0.0 }
 0x4c0   :  { %v2728_v32 = vadd.f32 %v2727_v48, %v2726_v46 }
 0x4c1   :  { %v4461_v13 = vadd.f32 %v4450_v51, %v2618_v17 }
 0x4c2   :  { %v2593_v14 = vpop.f32.mrf.mxu2 }
 0x4c3   :  { %v2757_v57 = vmul.f32 %v4461_v13, %v4461_v13  ;;  %v2716_v4 = vmul.f32 %v2667_v22, %v4461_v13 }
 0x4c4   :  { %v2504_v37 = vpop.f32.mrf.mxu1 }
 0x4c5   :  { %v2530_v49 = vadd.f32 %v2504_v37, %v2410_v43  ;;  %v2286_v41 = vpop.f32.mrf.mxu3  ;;  %v2729_v12 = vsel %vm1486_vm6, %v2716_v4, 0.0 }
 0x4c6   :  { %v2301_v55 = vadd.f32 %v2286_v41, %v4436_v42 }
 0x4c7   :  { %v2619_v54 = vadd.f32 %v2593_v14, %v2530_v49 }
 0x4c9   :  { %v4466_v50 = vadd.f32 %v4450_v51, %v2619_v54 }
 0x4ca   :  { %v2596_v1 = vpop.f32.mrf.mxu2 }
 0x4cb   :  { %v2758_v25 = vmul.f32 %v4466_v50, %v4466_v50  ;;  %v2717_v26 = vmul.f32 %v2672_v28, %v4466_v50 }
 0x4cc   :  { %v2507_v44 = vpop.f32.mrf.mxu1 }
 0x4cd   :  { %v2531_v23 = vadd.f32 %v2507_v44, %v2411_v60  ;;  %v2399_v44 = vpop.f32.mrf.mxu0  ;;  %v2770_v33 = vmul.f32 %v2758_v25, %v2672_v28  ;;  %v2288_v25 = vpop.f32.mrf.mxu3 }
 0x4ce   :  { %v2416_v52 = vadd.f32 %v2399_v44, %v2300_v6 }
 0x4cf   :  { %v2620_v29 = vadd.f32 %v2596_v1, %v2531_v23  ;;  %v2784_v28 = vsel %vm1486_vm6, %v2770_v33, 0.0 }
 0x4d1   :  { %v4474_v40 = vadd.f32 %v4450_v51, %v2620_v29 }
 0x4d2   :  { %v2598_v62 = vpop.f32.mrf.mxu2 }
 0x4d3   :  { %v2759_v36 = vmul.f32 %v4474_v40, %v4474_v40  ;;  %v2718_v42 = vmul.f32 %v2677_v19, %v4474_v40 }
 0x4d4   :  { %v2509_v56 = vpop.f32.mrf.mxu1 }
 0x4d5   :  { %v2532_v30 = vadd.f32 %v2509_v56, %v2412_v9  ;;  %v2771_v17 = vmul.f32 %v2759_v36, %v2677_v19  ;;  %v2733_v29 = vsel %vm1486_vm6, %v2718_v42, 0.0 }
 0x4d7   :  { %v2621_v7 = vadd.f32 %v2598_v62, %v2532_v30  ;;  %v2767_v62 = vmul.f32 %v2755_v59, %v2657_v18  ;;  %v2687_v18 = vpop.permute.xlu0 %2686 }
 0x4d9   :  { %v4481_v56 = vadd.f32 %v4450_v51, %v2621_v7  ;;  %v2779_v43 = vsel %vm1486_vm6, %v2767_v62, 0.0  ;;  %v2692_v7 = vpop.permute.xlu1 %2691 }
 0x4da   :  { %v2601_v24 = vpop.f32.mrf.mxu2 }
 0x4db   :  { %v2760_v49 = vmul.f32 %v4481_v56, %v4481_v56  ;;  %v2719_v8 = vmul.f32 %v2682_v15, %v4481_v56 }
 0x4dc   :  { %v2512_v11 = vpop.f32.mrf.mxu1 }
 0x4dd   :  { %v2533_v47 = vadd.f32 %v2512_v11, %v2413_v63  ;;  %v2730_v63 = vadd.f32 %v2729_v12, %v2728_v32  ;;  %v2772_v34 = vmul.f32 %v2760_v49, %v2682_v15 }
 0x4df   :  { %v2622_v14 = vadd.f32 %v2601_v24, %v2533_v47  ;;  %v2769_v24 = vmul.f32 %v2757_v57, %v2667_v22  ;;  %v2735_v57 = vsel %vm1486_vm6, %v2719_v8, 0.0  ;;  %v2788_v41 = vsel %vm1486_vm6, %v2772_v34, 0.0  ;;  %v2702_v62 = vpop.permute.xlu0 %2701 }
 0x4e1   :  { %v4487_v11 = vadd.f32 %v4450_v51, %v2622_v14  ;;  %v2782_v16 = vsel %vm1486_vm6, %v2769_v24, 0.0 }
 0x4e2   :  { %v2603_v27 = vpop.f32.mrf.mxu2 }
 0x4e3   :  { %v2761_v23 = vmul.f32 %v4487_v11, %v4487_v11  ;;  %v2720_v47 = vmul.f32 %v2687_v18, %v4487_v11 }
 0x4e4   :  { %v2514_v58 = vpop.f32.mrf.mxu1 }
 0x4e5   :  { %v2534_v45 = vadd.f32 %v2514_v58, %v2414_v31  ;;  %v2731_v58 = vsel %vm1486_vm6, %v2717_v26, 0.0  ;;  %v2773_v6 = vmul.f32 %v2761_v23, %v2687_v18 }
 0x4e7   :  { %v2623_v53 = vadd.f32 %v2603_v27, %v2534_v45  ;;  %v2780_v27 = vsel %vm1486_vm6, %v2768_v5, 0.0  ;;  %v2732_v45 = vadd.f32 %v2731_v58, %v2730_v63  ;;  %v2737_v5 = vsel %vm1486_vm6, %v2720_v47, 0.0  ;;  %v2707_v58 = vpop.permute.xlu1 %2706 }
 0x4e8   :  { %v2781_v30 = vadd.f32 %v2780_v27, %v2779_v43  ;;  %v2302_v43 = vadd.f32 %v2288_v25, %v4439_v0 }
 0x4e9   :  { %v4500_v61 = vadd.f32 %v4450_v51, %v2623_v53  ;;  %v2734_v44 = vadd.f32 %v2733_v29, %v2732_v45 }
 0x4ea   :  { %v2606_v2 = vpop.f32.mrf.mxu2  ;;  %v2783_v35 = vadd.f32 %v2782_v16, %v2781_v30 }
 0x4eb   :  { %v2762_v31 = vmul.f32 %v4500_v61, %v4500_v61  ;;  %v2721_v14 = vmul.f32 %v2692_v7, %v4500_v61  ;;  %v2736_v36 = vadd.f32 %v2735_v57, %v2734_v44 }
 0x4ec   :  { %v2517_v37 = vpop.f32.mrf.mxu1 }
 0x4ed   :  { %v2535_v1 = vadd.f32 %v2517_v37, %v2415_v21  ;;  %v2786_v21 = vsel %vm1486_vm6, %v2771_v17, 0.0  ;;  %v2774_v4 = vmul.f32 %v2762_v31, %v2692_v7  ;;  %v2739_v26 = vsel %vm1486_vm6, %v2721_v14, 0.0 }
 0x4ee   :  { %v2738_v49 = vadd.f32 %v2737_v5, %v2736_v36 }
 0x4ef   :  { %v2624_v38 = vadd.f32 %v2606_v2, %v2535_v1  ;;  %v2402_v2 = vpop.f32.mrf.mxu0  ;;  %v2785_v1 = vadd.f32 %v2784_v28, %v2783_v35 }
 0x4f0   :  { %v2417_v3 = vadd.f32 %v2402_v2, %v2301_v55  ;;  %v2740_v16 = vadd.f32 %v2739_v26, %v2738_v49 }
 0x4f1   :  { %v4508_v22 = vadd.f32 %v4450_v51, %v2624_v38  ;;  %v2787_v24 = vadd.f32 %v2786_v21, %v2785_v1 }
 0x4f2   :  { %v2608_v60 = vpop.f32.mrf.mxu2 }
 0x4f3   :  { %v2763_v37 = vmul.f32 %v4508_v22, %v4508_v22  ;;  %v2722_v53 = vmul.f32 %v2697_v20, %v4508_v22  ;;  %v2789_v33 = vadd.f32 %v2788_v41, %v2787_v24 }
 0x4f4   :  { %v2519_v9 = vpop.f32.mrf.mxu1 }
 0x4f5   :  { %v2536_v54 = vadd.f32 %v2519_v9, %v2416_v52  ;;  %v2790_v52 = vsel %vm1486_vm6, %v2773_v6, 0.0  ;;  %v2775_v38 = vmul.f32 %v2763_v37, %v2697_v20  ;;  %v2741_v27 = vsel %vm1486_vm6, %v2722_v53, 0.0  ;;  %v2712_v20 = vpop.permute.xlu2 %2711 }
 0x4f6   :  { %v2791_v32 = vadd.f32 %v2790_v52, %v2789_v33 }
 0x4f7   :  { %v2625_v59 = vadd.f32 %v2608_v60, %v2536_v54  ;;  %v2792_v60 = vsel %vm1486_vm6, %v2774_v4, 0.0  ;;  %v2794_v17 = vsel %vm1486_vm6, %v2775_v38, 0.0  ;;  %v2404_v8 = vpop.f32.mrf.mxu0  ;;  %v2742_v54 = vadd.f32 %v2741_v27, %v2740_v16 }
 0x4f8   :  { %v2793_v0 = vadd.f32 %v2792_v60, %v2791_v32  ;;  %v2418_v34 = vadd.f32 %v2404_v8, %v2302_v43 }
 0x4f9   :  { %v4521_v19 = vadd.f32 %v4450_v51, %v2625_v59 }
 0x4fa   :  { %v2611_v18 = vpop.f32.mrf.mxu2  ;;  %v2795_v29 = vadd.f32 %v2794_v17, %v2793_v0 }
 0x4fb   :  { %v2764_v15 = vmul.f32 %v4521_v19, %v4521_v19  ;;  %v2723_v55 = vmul.f32 %v2702_v62, %v4521_v19 }
 0x4fc   :  { %v2522_v48 = vpop.f32.mrf.mxu1 }
 0x4fd   :  { %v2537_v46 = vadd.f32 %v2522_v48, %v2417_v3  ;;  %v2776_v12 = vmul.f32 %v2764_v15, %v2702_v62  ;;  %v2743_v23 = vsel %vm1486_vm6, %v2723_v55, 0.0 }
 0x4fe   :  { %v2744_v47 = vadd.f32 %v2743_v23, %v2742_v54  ;;  %v2813_v23 = vld [vmem:[%s4619_s4 + $0x1] sm:$0x1]  ;;  %v2826_v54 = vld [vmem:[%s4619_s4 + $0x2] sm:$0x1] }
 0x4ff   :  { %v2626_v42 = vadd.f32 %v2611_v18, %v2537_v46  ;;  %v2796_v30 = vsel %vm1486_vm6, %v2776_v12, 0.0 }
 0x500   :  { %v2797_v35 = vadd.f32 %v2796_v30, %v2795_v29 }
 0x501   :  { %v4537_v9 = vadd.f32 %v4450_v51, %v2626_v42 }
 0x502   :  { %v2613_v21 = vpop.f32.mrf.mxu2 }
 0x503   :  { %v2724_v63 = vmul.f32 %v2707_v58, %v4537_v9  ;;  %v2765_v28 = vmul.f32 %v4537_v9, %v4537_v9 }
 0x504   :  { %v2524_v31 = vpop.f32.mrf.mxu1 }
 0x505   :  { %v2745_v59 = vsel %vm1486_vm6, %v2724_v63, 0.0  ;;  %v2777_v7 = vmul.f32 %v2765_v28, %v2707_v58  ;;  %v2538_v2 = vadd.f32 %v2524_v31, %v2418_v34 }
 0x506   :  { %v2746_v45 = vadd.f32 %v2745_v59, %v2744_v47 }
 0x507   :  { %v2798_v6 = vsel %vm1486_vm6, %v2777_v7, 0.0  ;;  %v2627_v57 = vadd.f32 %v2613_v21, %v2538_v2 }
 0x508   :  { %v2799_v14 = vadd.f32 %v2798_v6, %v2797_v35 }
 0x509   :  { %v2653_v37 = vadd.f32 %v4450_v51, %v2627_v57 }
 0x50b   :  { %v2725_v1 = vmul.f32 %v2712_v20, %v2653_v37  ;;  %v2766_v44 = vmul.f32 %v2653_v37, %v2653_v37 }
 0x50d   :  { %v2747_v41 = vsel %vm1661_vm12, %v2725_v1, 0.0  ;;  %v2778_v3 = vmul.f32 %v2766_v44, %v2712_v20 }
 0x50e   :  { %v2748_v62 = vadd.f32 %v2747_v41, %v2746_v45 }
 0x50f   :  { %v2800_v25 = vsel %vm1661_vm12, %v2778_v3, 0.0 }
 0x510   :  { %v2749_v5 = vrot.slane %v2748_v62, 4  ;;  %v2801_v4 = vadd.f32 %v2800_v25, %v2799_v14 }
 0x512   :  { %v2750_v53 = vadd.f32 %v2749_v5, %v2748_v62  ;;  %v2802_v15 = vrot.slane %v2801_v4, 4 }
 0x514   :  { %v2751_v24 = vrot.slane %v2750_v53, 2  ;;  %v2803_v36 = vadd.f32 %v2802_v15, %v2801_v4 }
 0x516   :  { %v2752_v52 = vadd.f32 %v2751_v24, %v2750_v53  ;;  %v2804_v18 = vrot.slane %v2803_v36, 2 }
 0x518   :  { %v2753_v48 = vrot.slane %v2752_v52, 1  ;;  %v2805_v26 = vadd.f32 %v2804_v18, %v2803_v36 }
 0x51a   :  { %v2754_v51 = vadd.f32 %v2753_v48, %v2752_v52  ;;  %v2806_v38 = vrot.slane %v2805_v26, 1 }
 0x51c   :  { %v2807_v55 = vadd.f32 %v2806_v38, %v2805_v26  ;;  %v2808_v46 = vmul.f32 0.03125, %v2754_v51 }
 0x51e   :  { %v2809_v43 = vmul.f32 0.03125, %v2807_v55  ;;  %v2810_v33 = vmul.f32 %v2808_v46, %v2808_v46 }
 0x520   :  { %v2811_v49 = vsub.f32 %v2809_v43, %v2810_v33 }
 0x522   :  { %v2812_v60 = vmax.f32 %v2811_v49, 0.0 }
 0x524   :  { %v2814_v27 = vadd.f32 1e-05, %v2812_v60 }
 0x526   :  { %3312 = vrsqrt.f32 %v2814_v27  ;;  %vm2821_vm14 = vweird.f32 %v2814_v27 }
 0x52c   :  { %v3313_v12 = vpop.eup %3312 }
 0x52d   :  { %v2816_v42 = vmul.f32 %v3313_v12, %v2814_v27  ;;  %vm2822_vm13 = vweird.f32 %v3313_v12 }
 0x52e   :  { %vm2823_vm15 = vmor %vm2821_vm14, %vm2822_vm13 }
 0x52f   :  { %v2817_v32 = vmul.f32 %v3313_v12, %v2816_v42 }
 0x531   :  { %v2818_v16 = vmul.f32 0.5, %v2817_v32 }
 0x533   :  { %v2819_v17 = vsub.f32 1.5, %v2818_v16 }
 0x535   :  { %v2820_v58 = vmul.f32 %v3313_v12, %v2819_v17 }
 0x537   :  { %v2824_v8 = vsel %vm2823_vm15, %v3313_v12, %v2820_v58 }
 0x538   :  { %v2825_v0 = vmul.f32 %v2824_v8, %v2813_v23 }
 0x53a   :  { %v2827_v30 = vmul.f32 %v2825_v0, %v2808_v46  ;;  %v2829_v63 = vperm.slane %v2825_v0, 0 }
 0x53c   :  { %v2828_v28 = vsub.f32 %v2826_v54, %v2827_v30  ;;  %v2830_v34 = vmul.f32 %v2829_v63, %v4454_v10  ;;  %v2831_v29 = vmul.f32 %v2829_v63, %v4458_v39  ;;  %v2832_v47 = vmul.f32 %v2829_v63, %v4461_v13 }
 0x53d   :  { %v2839_v31 = vmul.f32 %v2829_v63, %v4521_v19  ;;  %v2840_v59 = vmul.f32 %v2829_v63, %v4537_v9  ;;  %v2833_v7 = vmul.f32 %v2829_v63, %v4466_v50  ;;  %v2834_v2 = vmul.f32 %v2829_v63, %v4474_v40 }
 0x53e   :  { %v2841_v35 = vmul.f32 %v2829_v63, %v2653_v37  ;;  %v2842_v45 = vperm.slane %v2828_v28, 0  ;;  %v2835_v21 = vmul.f32 %v2829_v63, %v4481_v56  ;;  %v2836_v6 = vmul.f32 %v2829_v63, %v4487_v11 }
 0x53f   :  { %v2837_v10 = vmul.f32 %v2829_v63, %v4500_v61  ;;  %v2838_v39 = vmul.f32 %v2829_v63, %v4508_v22 }
 0x540   :  { %v2843_v57 = vadd.f32 %v2842_v45, %v2830_v34  ;;  %v2844_v13 = vadd.f32 %v2842_v45, %v2831_v29  ;;  %v2845_v14 = vadd.f32 %v2842_v45, %v2832_v47  ;;  %v2846_v19 = vadd.f32 %v2842_v45, %v2833_v7 }
 0x541   :  { %v2847_v20 = vadd.f32 %v2842_v45, %v2834_v2  ;;  %v2848_v9 = vadd.f32 %v2842_v45, %v2835_v21  ;;  %v2849_v1 = vadd.f32 %v2842_v45, %v2836_v6  ;;  %v2850_v50 = vadd.f32 %v2842_v45, %v2837_v10 }
 0x542   :  { %v2851_v44 = vadd.f32 %v2842_v45, %v2838_v39  ;;  %v2852_v40 = vadd.f32 %v2842_v45, %v2839_v31  ;;  %v2853_v37 = vadd.f32 %v2842_v45, %v2840_v59  ;;  %v2854_v41 = vadd.f32 %v2842_v45, %v2841_v35 }
 0x543   :  { %v2855_v3 = vmax.f32 %v2843_v57, 0.0  ;;  %v2856_v56 = vmax.f32 %v2844_v13, 0.0  ;;  %v2857_v62 = vmax.f32 %v2845_v14, 0.0  ;;  %v2858_v11 = vmax.f32 %v2846_v19, 0.0 }
 0x544   :  { %v2859_v25 = vmax.f32 %v2847_v20, 0.0  ;;  %v2860_v61 = vmax.f32 %v2848_v9, 0.0  ;;  %v2861_v22 = vmax.f32 %v2849_v1, 0.0  ;;  %v2862_v5 = vmax.f32 %v2850_v50, 0.0 }
 0x545   :  { %2867 = vst.msk [vmem:[%s4620_s7] sm:$0xff] %vm1486_vm6, %v2855_v3  ;;  %v2863_v4 = vmax.f32 %v2851_v44, 0.0  ;;  %v2864_v53 = vmax.f32 %v2852_v40, 0.0  ;;  %v2865_v15 = vmax.f32 %v2853_v37, 0.0  ;;  %v2866_v24 = vmax.f32 %v2854_v41, 0.0 }
 0x546   :  { %2868 = vst.msk [vmem:[%s4620_s7 + $0x8] sm:$0xff] %vm1486_vm6, %v2856_v56 }
 0x547   :  { %2869 = vst.msk [vmem:[%s4620_s7 + $0x10] sm:$0xff] %vm1486_vm6, %v2857_v62 }
 0x548   :  { %2870 = vst.msk [vmem:[%s4620_s7 + $0x18] sm:$0xff] %vm1486_vm6, %v2858_v11 }
 0x549   :  { %2871 = vst.msk [vmem:[%s4620_s7 + $0x20] sm:$0xff] %vm1486_vm6, %v2859_v25 }
 0x54a   :  { %2872 = vst.msk [vmem:[%s4620_s7 + $0x28] sm:$0xff] %vm1486_vm6, %v2860_v61 }
 0x54b   :  { %2873 = vst.msk [vmem:[%s4620_s7 + $0x30] sm:$0xff] %vm1486_vm6, %v2861_v22 }
 0x54c   :  { %2874 = vst.msk [vmem:[%s4620_s7 + $0x38] sm:$0xff] %vm1486_vm6, %v2862_v5 }
 0x54d   :  { %2875 = vst.msk [vmem:[%s4620_s7 + $0x40] sm:$0xff] %vm1486_vm6, %v2863_v4 }
 0x54e   :  { %2876 = vst.msk [vmem:[%s4620_s7 + $0x48] sm:$0xff] %vm1486_vm6, %v2864_v53 }
 0x54f   :  { %2877 = vst.msk [vmem:[%s4620_s7 + $0x50] sm:$0xff] %vm1486_vm6, %v2865_v15 }
 0x550   :  { %2878 = vst.msk [vmem:[%s4620_s7 + $0x58] sm:$0xf] %vm1661_vm12, %v2866_v24 }

</bundles_post_ra>
